<compile_context>
chip_gen: v6e
topology: v6e:2x2x1
jax: 0.10.0
libtpu: 0.0.40
codegen_flags: <defaults>
</compile_context>

<pallas_src>
import math
import functools
import numpy as np
import jax
import jax.numpy as jnp
from jax.experimental import pallas as pl
from jax.experimental.pallas import tpu as pltpu

K = 5
PAD = 2


# ----------------------------- Pallas kernel ------------------------------ #
def _fused_conv5x5_kernel(x_ref, w_ref, b_ref, o_ref, p_ref, acc_ref, *,
                          tile_h, W, Ws, cin):
    # x_ref  : (1, 1, cin, Lp)         flattened, halo'd, zero-padded input band (bf16)
    # w_ref  : (Cout, K*grp)           fused weights, (kw, kh, ci)-major, padded groups (bf16)
    # b_ref  : (Cout, 1)               fused bias (f32)
    # o_ref  : (1, Cout, tile_h*W)     lane-dense output band (f32)
    # p_ref  : (K*grp, tile_h*Ws)      im2col patch scratch (bf16)
    # acc_ref: (Cout, tile_h*Ws)       matmul + bias + relu scratch (f32)
    Lq = tile_h * Ws
    grp = -(-(K * cin) // 16) * 16          # rows per kw group, padded to bf16 sublane tile

    # Dummy (zero) rows pad each kw group from K*cin to grp rows; their weights are zero.
    # Hoisted out of the loop (JAX does not CSE broadcast_in_dim).
    n_dummy = grp - K * cin
    if n_dummy:
        zrows = jnp.zeros((n_dummy, Lq), dtype=jnp.bfloat16)

    # im2col, grouped stores: for each kw, the 5 kh windows (each a contiguous lane-window of
    # the flattened band at offset kh*Ws + kw) are concatenated along sublanes and written
    # with ONE 16-sublane-aligned store instead of 25 masked 3-sublane stores.
    for kw in range(K):
        pieces = [x_ref[0, 0, :, kh * Ws + kw: kh * Ws + kw + Lq] for kh in range(K)]
        if n_dummy:
            pieces.append(zrows)
        p_ref[kw * grp:(kw + 1) * grp, :] = jnp.concatenate(pieces, axis=0)

    # Single fused MXU matmul over the 80-column contraction, + bias, + ReLU (f32 accum).
    acc_ref[...] = jnp.maximum(
        jnp.dot(w_ref[...], p_ref[...], preferred_element_type=jnp.float32)
        + b_ref[...],
        0.0)

    # Lane-dense output: crop the W valid columns of each row (drops the Ws - W halo columns,
    # computed on don't-care data) and compact them at lane offset h*W of the output block.
    # Cout stays on sublanes for both source and destination -> no sublane scatter.
    for h in range(tile_h):
        o_ref[0, :, h * W:(h + 1) * W] = acc_ref[:, h * Ws:h * Ws + W]


# ------------------------------ tile picking ------------------------------- #
def _pick_tile_h(H, W, Ws, cout, n_batch,
                 budget_bytes=40 * 1024 * 1024, max_tile_h=128):
    """Largest tile_h (multiple of 8, divides H, tile_h*W % 128 == 0) within the VMEM budget.

    Falls back to tile_h = H (full-dim block exemption from the (8,128) rule) for awkward H.
    """
    def rup(n, m):
        return -(-n // m) * m

    def vmem_est(th):
        lq = th * Ws
        lp = (th + 2 * PAD + 1) * Ws
        return (2 * 16 * rup(lp, 128) * 2               # input band, double-buffered, bf16
                + K * 16 * rup(lq, 128) * 2             # im2col patch scratch, bf16
                + rup(cout, 8) * rup(lq, 128) * 4       # matmul/relu scratch, f32
                + 2 * rup(cout, 8) * rup(th * W, 128) * 4)  # output block, double-buffered

    cands = [th for th in range(8, min(H, max_tile_h) + 1, 8)
             if H % th == 0 and (th * W) % 128 == 0 and vmem_est(th) <= budget_bytes]
    if not cands:
        return H
    multi = [th for th in cands if n_batch * (H // th) >= 2]   # keep both TCs busy (v7x)
    return max(multi) if multi else max(cands)


# --------------------------------- wrapper --------------------------------- #
def combind_conv2d_forward(x_nchw, w_mat, bias, *, tile_h=None, align_waste_frac=0.125):
    """x_nchw: (N, 3, H, W) f32; w_mat: (Cout, K*grp) bf16; bias: (Cout,) f32
    -> (N, Cout, H, W) f32."""
    N, Cin, H, W = x_nchw.shape
    Cout = w_mat.shape[0]
    grp = -(-(K * Cin) // 16) * 16
    assert w_mat.shape[1] == K * grp, (w_mat.shape, K * grp)

    # Row stride of the flattened band: pad to a multiple of 128 when the waste is small,
    # so kh*Ws and h*Ws offsets are lane-aligned; otherwise stay dense (Ws = W + 4).
    Wp = W + 2 * PAD
    Ws_aligned = -(-Wp // 128) * 128
    Ws = Ws_aligned if (Ws_aligned - Wp) <= align_waste_frac * Wp else Wp

    if tile_h is None:
        tile_h = _pick_tile_h(H, W, Ws, Cout, N)
    assert H % tile_h == 0, (H, tile_h)
    assert (tile_h * W) % 128 == 0 or tile_h == H, (tile_h, W)
    nT = H // tile_h
    Lq = tile_h * Ws
    Lp = (tile_h + 2 * PAD + 1) * Ws   # +1 extra halo row so flat lane-windows stay in-bounds

    # Pad (top 2, bottom 3, left 2, right Ws-W-2) and gather overlapping H bands.
    # TODO(synk): this casts+copies the tiny 3-channel input once in HBM; could be fused into
    # the kernel with an overlapping-band BlockSpec (low priority per review).
    xb = x_nchw.astype(jnp.bfloat16)
    xpad = jnp.pad(xb, ((0, 0), (0, 0), (PAD, PAD + 1), (PAD, Ws - W - PAD)))
    ridx = (jnp.arange(nT)[:, None] * tile_h
            + jnp.arange(tile_h + 2 * PAD + 1)[None, :])        # (nT, tile_h+5)
    xt = xpad[:, :, ridx, :]                                    # (N, Cin, nT, tile_h+5, Ws)
    xt = jnp.transpose(xt, (0, 2, 1, 3, 4)).reshape(N, nT, Cin, Lp)

    b2 = bias.reshape(Cout, 1).astype(jnp.float32)

    kernel = functools.partial(_fused_conv5x5_kernel,
                               tile_h=tile_h, W=W, Ws=Ws, cin=Cin)
    out = pl.pallas_call(
        kernel,
        out_shape=jax.ShapeDtypeStruct((N, Cout, H * W), jnp.float32),
        grid=(N, nT),
        in_specs=[
            pl.BlockSpec((1, 1, Cin, Lp), lambda n, t: (n, t, 0, 0)),
            pl.BlockSpec((Cout, K * grp), lambda n, t: (0, 0)),
            pl.BlockSpec((Cout, 1), lambda n, t: (0, 0)),
        ],
        out_specs=pl.BlockSpec((1, Cout, tile_h * W), lambda n, t: (n, 0, t)),
        scratch_shapes=[
            pltpu.VMEM((K * grp, Lq), jnp.bfloat16),
            pltpu.VMEM((Cout, Lq), jnp.float32),
        ],
        compiler_params=pltpu.CompilerParams(
            dimension_semantics=("parallel", "parallel"),
            vmem_limit_bytes=48 * 1024 * 1024),
    )(xt, w_mat, b2)
    return out.reshape(N, Cout, H, W)   # free row-major reshape


# ------------------------- parameter construction ------------------------- #
def _build_srm_kernel_np():
    # Exact replication of SRMConv2D._build_SRM_kernel (incl. keras->pytorch swaps).
    srm1 = np.zeros([5, 5], dtype=np.float32)
    srm1[1:-1, 1:-1] = np.array([[-1, 2, -1], [2, -4, 2], [-1, 2, -1]])
    srm1 /= 4.0
    srm2 = np.array([[-1, 2, -2, 2, -1],
                     [2, -6, 8, -6, 2],
                     [-2, 8, -12, 8, -2],
                     [2, -6, 8, -6, 2],
                     [-1, 2, -2, 2, -1]], dtype=np.float32)
    srm2 /= 12.0
    srm3 = np.zeros([5, 5], dtype=np.float32)
    srm3[2, 1:-1] = np.array([1, -2, 1])
    srm3 /= 2.0

    kernel = []
    for srm in (srm1, srm2, srm3):
        for ch in range(3):
            this_ch_kernel = np.zeros([5, 5, 3], dtype=np.float32)
            this_ch_kernel[:, :, ch] = srm
            kernel.append(this_ch_kernel)
    kernel = np.stack(kernel, axis=-1)          # (5, 5, 3, 9)
    kernel = np.swapaxes(kernel, 1, 2)          # (5, 3, 5, 9)
    kernel = np.swapaxes(kernel, 0, 3)          # (9, 3, 5, 5)  OIHW
    return kernel


def build_combind_conv2d_params(output_channels, key):
    assert output_channels > 12, "outputChanels must exceed 12 (3 + 9)"
    k_bayar, k_w3, k_b3 = jax.random.split(key, 3)

    # --- BayarConv2D(3, 3, 5): xavier_normal init, then Bayar constraint ---
    fan = 3 * K * K
    std = math.sqrt(2.0 / (fan + fan))
    w_bayar = std * jax.random.normal(k_bayar, (3, 3, K, K), dtype=jnp.float32)
    mask = jnp.zeros((3, 3, K, K), jnp.float32).at[:, :, K // 2, K // 2].set(1.0)
    w_bayar = w_bayar * (1.0 - mask)
    rest_sum = jnp.sum(w_bayar, axis=(2, 3), keepdims=True)
    w_bayar = w_bayar / (rest_sum + 1e-7)
    w_bayar = w_bayar - mask                                   # (3, 3, 5, 5)

    # --- SRMConv2D fixed weights ---
    w_srm = jnp.asarray(_build_srm_kernel_np())                # (9, 3, 5, 5)

    # --- nn.Conv2d(3, outC - 12, 5, padding=2): default torch init ---
    c3 = output_channels - 3 - 9
    bound = 1.0 / math.sqrt(3 * K * K)
    w3 = jax.random.uniform(k_w3, (c3, 3, K, K), jnp.float32, -bound, bound)
    b3 = jax.random.uniform(k_b3, (c3,), jnp.float32, -bound, bound)

    w_all_oihw = jnp.concatenate([w_bayar, w_srm, w3], axis=0)   # (outC, 3, 5, 5)
    b_all = jnp.concatenate([jnp.zeros((3 + 9,), jnp.float32), b3], axis=0)
    return w_all_oihw, b_all


def pack_weights(w_oihw):
    """(Cout, 3, 5, 5) OIHW -> (Cout, K*grp) bf16 with (kw, kh, ci)-major columns; each kw
    group padded to 16 columns whose extra (dummy) columns are zero, matching the kernel's
    16-sublane-aligned im2col groups."""
    cout, cin = w_oihw.shape[0], w_oihw.shape[1]
    grp = -(-(K * cin) // 16) * 16
    w = jnp.transpose(w_oihw, (0, 3, 2, 1))            # (Cout, kw, kh, ci)
    w = w.reshape(cout, K, K * cin)
    w = jnp.pad(w, ((0, 0), (0, 0), (0, grp - K * cin)))
    return w.reshape(cout, K * grp).astype(jnp.bfloat16)


# ------------------------------- demo / test ------------------------------- #
def _reference(x, w_oihw, bias):
    # XLA conv with the SAME bf16-rounded inputs and f32 accumulation.
    ref = jax.lax.conv_general_dilated(
        x.astype(jnp.bfloat16), w_oihw.astype(jnp.bfloat16),
        window_strides=(1, 1), padding=((PAD, PAD), (PAD, PAD)),
        dimension_numbers=("NCHW", "OIHW", "NCHW"),
        preferred_element_type=jnp.float32)
    return jnp.maximum(ref + bias[None, :, None, None], 0.0)


if __name__ == "__main__":
    OUTPUT_CHANNELS = 16           # conv3 branch has 16 - 3 - 9 = 4 channels
    key = jax.random.PRNGKey(0)
    k_params, k_x, k_x2 = jax.random.split(key, 3)
    w_oihw, bias = build_combind_conv2d_params(OUTPUT_CHANNELS, k_params)
    w_mat = pack_weights(w_oihw)

    fwd = jax.jit(combind_conv2d_forward)

    # Main test: N=2, 3x16x16.
    N, CIN, H, W = 2, 3, 16, 16
    x = jax.random.normal(k_x, (N, CIN, H, W), dtype=jnp.float32)
    y = jax.block_until_ready(fwd(x, w_mat, bias))
    assert y.shape == (N, OUTPUT_CHANNELS, H, W), y.shape
    np.testing.assert_allclose(np.asarray(y), np.asarray(_reference(x, w_oihw, bias)),
                               rtol=1e-2, atol=1e-2)

    # Awkward-shape test (H not divisible by 8 -> single full-height band; odd-ish W).
    x2 = jax.random.normal(k_x2, (1, CIN, 12, 20), dtype=jnp.float32)
    y2 = jax.block_until_ready(fwd(x2, w_mat, bias))
    assert y2.shape == (1, OUTPUT_CHANNELS, 12, 20), y2.shape
    np.testing.assert_allclose(np.asarray(y2), np.asarray(_reference(x2, w_oihw, bias)),
                               rtol=1e-2, atol=1e-2)

    print("KERNEL_OK")
</pallas_src>

<mosaic_0001>
module attributes {stable_mosaic.version = 11 : i64} {
  func.func @_fused_conv5x5_kernel(%arg0: i32, %arg1: i32, %arg2: memref<1x1x3x420xbf16, #tpu.memory_space<vmem>>, %arg3: memref<16x80xbf16, #tpu.memory_space<vmem>>, %arg4: memref<16x1xf32, #tpu.memory_space<vmem>>, %arg5: memref<1x16x256xf32, #tpu.memory_space<vmem>>, %arg6: memref<80x320xbf16, #tpu.memory_space<vmem>>, %arg7: memref<16x320xf32, #tpu.memory_space<vmem>>) attributes {dimension_semantics = [#tpu.dimension_semantics<parallel>, #tpu.dimension_semantics<parallel>], iteration_bounds = array<i64: 2, 1>, scalar_prefetch = 0 : i64, scratch_operands = 2 : i64, tpu.core_type = #tpu.core_type<tc>, window_params = [{transform_indices = @transform_0, window_bounds = array<i64: 1, 1, 3, 420>}, {pipeline_mode = #tpu.pipeline_mode<synchronous>, transform_indices = @transform_1, window_bounds = array<i64: 16, 80>}, {pipeline_mode = #tpu.pipeline_mode<synchronous>, transform_indices = @transform_2, window_bounds = array<i64: 16, 1>}, {transform_indices = @transform_3, window_bounds = array<i64: 1, 16, 256>}]} {
    %cst = arith.constant 0.000000e+00 : bf16
    %0 = vector.broadcast %cst : bf16 to vector<1x320xbf16>
    %c0 = arith.constant 0 : index
    %c0_0 = arith.constant 0 : index
    %c0_1 = arith.constant 0 : index
    %c0_2 = arith.constant 0 : index
    %1 = vector.load %arg2[%c0, %c0_0, %c0_1, %c0_2] : memref<1x1x3x420xbf16, #tpu.memory_space<vmem>>, vector<1x1x3x320xbf16>
    %2 = vector.shape_cast %1 : vector<1x1x3x320xbf16> to vector<3x320xbf16>
    %c0_3 = arith.constant 0 : index
    %c0_4 = arith.constant 0 : index
    %c0_5 = arith.constant 0 : index
    %c20 = arith.constant 20 : index
    %3 = vector.load %arg2[%c0_3, %c0_4, %c0_5, %c20] : memref<1x1x3x420xbf16, #tpu.memory_space<vmem>>, vector<1x1x3x320xbf16>
    %4 = vector.shape_cast %3 : vector<1x1x3x320xbf16> to vector<3x320xbf16>
    %c0_6 = arith.constant 0 : index
    %c0_7 = arith.constant 0 : index
    %c0_8 = arith.constant 0 : index
    %c40 = arith.constant 40 : index
    %5 = vector.load %arg2[%c0_6, %c0_7, %c0_8, %c40] : memref<1x1x3x420xbf16, #tpu.memory_space<vmem>>, vector<1x1x3x320xbf16>
    %6 = vector.shape_cast %5 : vector<1x1x3x320xbf16> to vector<3x320xbf16>
    %c0_9 = arith.constant 0 : index
    %c0_10 = arith.constant 0 : index
    %c0_11 = arith.constant 0 : index
    %c60 = arith.constant 60 : index
    %7 = vector.load %arg2[%c0_9, %c0_10, %c0_11, %c60] : memref<1x1x3x420xbf16, #tpu.memory_space<vmem>>, vector<1x1x3x320xbf16>
    %8 = vector.shape_cast %7 : vector<1x1x3x320xbf16> to vector<3x320xbf16>
    %c0_12 = arith.constant 0 : index
    %c0_13 = arith.constant 0 : index
    %c0_14 = arith.constant 0 : index
    %c80 = arith.constant 80 : index
    %9 = vector.load %arg2[%c0_12, %c0_13, %c0_14, %c80] : memref<1x1x3x420xbf16, #tpu.memory_space<vmem>>, vector<1x1x3x320xbf16>
    %10 = vector.shape_cast %9 : vector<1x1x3x320xbf16> to vector<3x320xbf16>
    %11 = tpu.concatenate %2, %4, %6, %8, %10, %0 in 0 : vector<3x320xbf16>, vector<3x320xbf16>, vector<3x320xbf16>, vector<3x320xbf16>, vector<3x320xbf16>, vector<1x320xbf16> -> vector<16x320xbf16>
    %c0_15 = arith.constant 0 : index
    %c0_16 = arith.constant 0 : index
    %12 = vector.load %arg6[%c0_15, %c0_16] : memref<80x320xbf16, #tpu.memory_space<vmem>>, vector<16x320xbf16>
    tpu.vector_store %arg6[%c0_15, %c0_16], %11 {strides = array<i32>} : memref<80x320xbf16, #tpu.memory_space<vmem>>, vector<16x320xbf16>,
    %c0_17 = arith.constant 0 : index
    %c0_18 = arith.constant 0 : index
    %c0_19 = arith.constant 0 : index
    %c1 = arith.constant 1 : index
    %13 = vector.load %arg2[%c0_17, %c0_18, %c0_19, %c1] : memref<1x1x3x420xbf16, #tpu.memory_space<vmem>>, vector<1x1x3x320xbf16>
    %14 = vector.shape_cast %13 : vector<1x1x3x320xbf16> to vector<3x320xbf16>
    %c0_20 = arith.constant 0 : index
    %c0_21 = arith.constant 0 : index
    %c0_22 = arith.constant 0 : index
    %c21 = arith.constant 21 : index
    %15 = vector.load %arg2[%c0_20, %c0_21, %c0_22, %c21] : memref<1x1x3x420xbf16, #tpu.memory_space<vmem>>, vector<1x1x3x320xbf16>
    %16 = vector.shape_cast %15 : vector<1x1x3x320xbf16> to vector<3x320xbf16>
    %c0_23 = arith.constant 0 : index
    %c0_24 = arith.constant 0 : index
    %c0_25 = arith.constant 0 : index
    %c41 = arith.constant 41 : index
    %17 = vector.load %arg2[%c0_23, %c0_24, %c0_25, %c41] : memref<1x1x3x420xbf16, #tpu.memory_space<vmem>>, vector<1x1x3x320xbf16>
    %18 = vector.shape_cast %17 : vector<1x1x3x320xbf16> to vector<3x320xbf16>
    %c0_26 = arith.constant 0 : index
    %c0_27 = arith.constant 0 : index
    %c0_28 = arith.constant 0 : index
    %c61 = arith.constant 61 : index
    %19 = vector.load %arg2[%c0_26, %c0_27, %c0_28, %c61] : memref<1x1x3x420xbf16, #tpu.memory_space<vmem>>, vector<1x1x3x320xbf16>
    %20 = vector.shape_cast %19 : vector<1x1x3x320xbf16> to vector<3x320xbf16>
    %c0_29 = arith.constant 0 : index
    %c0_30 = arith.constant 0 : index
    %c0_31 = arith.constant 0 : index
    %c81 = arith.constant 81 : index
    %21 = vector.load %arg2[%c0_29, %c0_30, %c0_31, %c81] : memref<1x1x3x420xbf16, #tpu.memory_space<vmem>>, vector<1x1x3x320xbf16>
    %22 = vector.shape_cast %21 : vector<1x1x3x320xbf16> to vector<3x320xbf16>
    %23 = tpu.concatenate %14, %16, %18, %20, %22, %0 in 0 : vector<3x320xbf16>, vector<3x320xbf16>, vector<3x320xbf16>, vector<3x320xbf16>, vector<3x320xbf16>, vector<1x320xbf16> -> vector<16x320xbf16>
    %c16 = arith.constant 16 : index
    %c0_32 = arith.constant 0 : index
    %24 = vector.load %arg6[%c16, %c0_32] : memref<80x320xbf16, #tpu.memory_space<vmem>>, vector<16x320xbf16>
    tpu.vector_store %arg6[%c16, %c0_32], %23 {strides = array<i32>} : memref<80x320xbf16, #tpu.memory_space<vmem>>, vector<16x320xbf16>,
    %c0_33 = arith.constant 0 : index
    %c0_34 = arith.constant 0 : index
    %c0_35 = arith.constant 0 : index
    %c2 = arith.constant 2 : index
    %25 = vector.load %arg2[%c0_33, %c0_34, %c0_35, %c2] : memref<1x1x3x420xbf16, #tpu.memory_space<vmem>>, vector<1x1x3x320xbf16>
    %26 = vector.shape_cast %25 : vector<1x1x3x320xbf16> to vector<3x320xbf16>
    %c0_36 = arith.constant 0 : index
    %c0_37 = arith.constant 0 : index
    %c0_38 = arith.constant 0 : index
    %c22 = arith.constant 22 : index
    %27 = vector.load %arg2[%c0_36, %c0_37, %c0_38, %c22] : memref<1x1x3x420xbf16, #tpu.memory_space<vmem>>, vector<1x1x3x320xbf16>
    %28 = vector.shape_cast %27 : vector<1x1x3x320xbf16> to vector<3x320xbf16>
    %c0_39 = arith.constant 0 : index
    %c0_40 = arith.constant 0 : index
    %c0_41 = arith.constant 0 : index
    %c42 = arith.constant 42 : index
    %29 = vector.load %arg2[%c0_39, %c0_40, %c0_41, %c42] : memref<1x1x3x420xbf16, #tpu.memory_space<vmem>>, vector<1x1x3x320xbf16>
    %30 = vector.shape_cast %29 : vector<1x1x3x320xbf16> to vector<3x320xbf16>
    %c0_42 = arith.constant 0 : index
    %c0_43 = arith.constant 0 : index
    %c0_44 = arith.constant 0 : index
    %c62 = arith.constant 62 : index
    %31 = vector.load %arg2[%c0_42, %c0_43, %c0_44, %c62] : memref<1x1x3x420xbf16, #tpu.memory_space<vmem>>, vector<1x1x3x320xbf16>
    %32 = vector.shape_cast %31 : vector<1x1x3x320xbf16> to vector<3x320xbf16>
    %c0_45 = arith.constant 0 : index
    %c0_46 = arith.constant 0 : index
    %c0_47 = arith.constant 0 : index
    %c82 = arith.constant 82 : index
    %33 = vector.load %arg2[%c0_45, %c0_46, %c0_47, %c82] : memref<1x1x3x420xbf16, #tpu.memory_space<vmem>>, vector<1x1x3x320xbf16>
    %34 = vector.shape_cast %33 : vector<1x1x3x320xbf16> to vector<3x320xbf16>
    %35 = tpu.concatenate %26, %28, %30, %32, %34, %0 in 0 : vector<3x320xbf16>, vector<3x320xbf16>, vector<3x320xbf16>, vector<3x320xbf16>, vector<3x320xbf16>, vector<1x320xbf16> -> vector<16x320xbf16>
    %c32 = arith.constant 32 : index
    %c0_48 = arith.constant 0 : index
    %36 = vector.load %arg6[%c32, %c0_48] : memref<80x320xbf16, #tpu.memory_space<vmem>>, vector<16x320xbf16>
    tpu.vector_store %arg6[%c32, %c0_48], %35 {strides = array<i32>} : memref<80x320xbf16, #tpu.memory_space<vmem>>, vector<16x320xbf16>,
    %c0_49 = arith.constant 0 : index
    %c0_50 = arith.constant 0 : index
    %c0_51 = arith.constant 0 : index
    %c3 = arith.constant 3 : index
    %37 = vector.load %arg2[%c0_49, %c0_50, %c0_51, %c3] : memref<1x1x3x420xbf16, #tpu.memory_space<vmem>>, vector<1x1x3x320xbf16>
    %38 = vector.shape_cast %37 : vector<1x1x3x320xbf16> to vector<3x320xbf16>
    %c0_52 = arith.constant 0 : index
    %c0_53 = arith.constant 0 : index
    %c0_54 = arith.constant 0 : index
    %c23 = arith.constant 23 : index
    %39 = vector.load %arg2[%c0_52, %c0_53, %c0_54, %c23] : memref<1x1x3x420xbf16, #tpu.memory_space<vmem>>, vector<1x1x3x320xbf16>
    %40 = vector.shape_cast %39 : vector<1x1x3x320xbf16> to vector<3x320xbf16>
    %c0_55 = arith.constant 0 : index
    %c0_56 = arith.constant 0 : index
    %c0_57 = arith.constant 0 : index
    %c43 = arith.constant 43 : index
    %41 = vector.load %arg2[%c0_55, %c0_56, %c0_57, %c43] : memref<1x1x3x420xbf16, #tpu.memory_space<vmem>>, vector<1x1x3x320xbf16>
    %42 = vector.shape_cast %41 : vector<1x1x3x320xbf16> to vector<3x320xbf16>
    %c0_58 = arith.constant 0 : index
    %c0_59 = arith.constant 0 : index
    %c0_60 = arith.constant 0 : index
    %c63 = arith.constant 63 : index
    %43 = vector.load %arg2[%c0_58, %c0_59, %c0_60, %c63] : memref<1x1x3x420xbf16, #tpu.memory_space<vmem>>, vector<1x1x3x320xbf16>
    %44 = vector.shape_cast %43 : vector<1x1x3x320xbf16> to vector<3x320xbf16>
    %c0_61 = arith.constant 0 : index
    %c0_62 = arith.constant 0 : index
    %c0_63 = arith.constant 0 : index
    %c83 = arith.constant 83 : index
    %45 = vector.load %arg2[%c0_61, %c0_62, %c0_63, %c83] : memref<1x1x3x420xbf16, #tpu.memory_space<vmem>>, vector<1x1x3x320xbf16>
    %46 = vector.shape_cast %45 : vector<1x1x3x320xbf16> to vector<3x320xbf16>
    %47 = tpu.concatenate %38, %40, %42, %44, %46, %0 in 0 : vector<3x320xbf16>, vector<3x320xbf16>, vector<3x320xbf16>, vector<3x320xbf16>, vector<3x320xbf16>, vector<1x320xbf16> -> vector<16x320xbf16>
    %c48 = arith.constant 48 : index
    %c0_64 = arith.constant 0 : index
    %48 = vector.load %arg6[%c48, %c0_64] : memref<80x320xbf16, #tpu.memory_space<vmem>>, vector<16x320xbf16>
    tpu.vector_store %arg6[%c48, %c0_64], %47 {strides = array<i32>} : memref<80x320xbf16, #tpu.memory_space<vmem>>, vector<16x320xbf16>,
    %c0_65 = arith.constant 0 : index
    %c0_66 = arith.constant 0 : index
    %c0_67 = arith.constant 0 : index
    %c4 = arith.constant 4 : index
    %49 = vector.load %arg2[%c0_65, %c0_66, %c0_67, %c4] : memref<1x1x3x420xbf16, #tpu.memory_space<vmem>>, vector<1x1x3x320xbf16>
    %50 = vector.shape_cast %49 : vector<1x1x3x320xbf16> to vector<3x320xbf16>
    %c0_68 = arith.constant 0 : index
    %c0_69 = arith.constant 0 : index
    %c0_70 = arith.constant 0 : index
    %c24 = arith.constant 24 : index
    %51 = vector.load %arg2[%c0_68, %c0_69, %c0_70, %c24] : memref<1x1x3x420xbf16, #tpu.memory_space<vmem>>, vector<1x1x3x320xbf16>
    %52 = vector.shape_cast %51 : vector<1x1x3x320xbf16> to vector<3x320xbf16>
    %c0_71 = arith.constant 0 : index
    %c0_72 = arith.constant 0 : index
    %c0_73 = arith.constant 0 : index
    %c44 = arith.constant 44 : index
    %53 = vector.load %arg2[%c0_71, %c0_72, %c0_73, %c44] : memref<1x1x3x420xbf16, #tpu.memory_space<vmem>>, vector<1x1x3x320xbf16>
    %54 = vector.shape_cast %53 : vector<1x1x3x320xbf16> to vector<3x320xbf16>
    %c0_74 = arith.constant 0 : index
    %c0_75 = arith.constant 0 : index
    %c0_76 = arith.constant 0 : index
    %c64 = arith.constant 64 : index
    %55 = vector.load %arg2[%c0_74, %c0_75, %c0_76, %c64] : memref<1x1x3x420xbf16, #tpu.memory_space<vmem>>, vector<1x1x3x320xbf16>
    %56 = vector.shape_cast %55 : vector<1x1x3x320xbf16> to vector<3x320xbf16>
    %c0_77 = arith.constant 0 : index
    %c0_78 = arith.constant 0 : index
    %c0_79 = arith.constant 0 : index
    %c84 = arith.constant 84 : index
    %57 = vector.load %arg2[%c0_77, %c0_78, %c0_79, %c84] : memref<1x1x3x420xbf16, #tpu.memory_space<vmem>>, vector<1x1x3x320xbf16>
    %58 = vector.shape_cast %57 : vector<1x1x3x320xbf16> to vector<3x320xbf16>
    %59 = tpu.concatenate %50, %52, %54, %56, %58, %0 in 0 : vector<3x320xbf16>, vector<3x320xbf16>, vector<3x320xbf16>, vector<3x320xbf16>, vector<3x320xbf16>, vector<1x320xbf16> -> vector<16x320xbf16>
    %c64_80 = arith.constant 64 : index
    %c0_81 = arith.constant 0 : index
    %60 = vector.load %arg6[%c64_80, %c0_81] : memref<80x320xbf16, #tpu.memory_space<vmem>>, vector<16x320xbf16>
    tpu.vector_store %arg6[%c64_80, %c0_81], %59 {strides = array<i32>} : memref<80x320xbf16, #tpu.memory_space<vmem>>, vector<16x320xbf16>,
    %c0_82 = arith.constant 0 : index
    %c0_83 = arith.constant 0 : index
    %61 = vector.load %arg3[%c0_82, %c0_83] : memref<16x80xbf16, #tpu.memory_space<vmem>>, vector<16x80xbf16>
    %c0_84 = arith.constant 0 : index
    %c0_85 = arith.constant 0 : index
    %62 = vector.load %arg6[%c0_84, %c0_85] : memref<80x320xbf16, #tpu.memory_space<vmem>>, vector<80x320xbf16>
    %cst_86 = arith.constant dense<0.000000e+00> : vector<16x320xf32>
    %63 = tpu.matmul %61, %62, %cst_86 {dimension_numbers = #tpu.dot_dimension_numbers<[1], [0], [0], [1], [0, 0, 1, 1], [], []>} : vector<16x80xbf16>, vector<80x320xbf16>, vector<16x320xf32> -> vector<16x320xf32>
    %c0_87 = arith.constant 0 : index
    %c0_88 = arith.constant 0 : index
    %64 = vector.load %arg4[%c0_87, %c0_88] : memref<16x1xf32, #tpu.memory_space<vmem>>, vector<16x1xf32>
    %65 = vector.broadcast %64 : vector<16x1xf32> to vector<16x320xf32>
    %66 = arith.addf %63, %65 : vector<16x320xf32>
    %cst_89 = arith.constant 0.000000e+00 : f32
    %67 = vector.broadcast %cst_89 : f32 to vector<16x320xf32>
    %68 = arith.maximumf %66, %67 : vector<16x320xf32>
    %c0_90 = arith.constant 0 : index
    %c0_91 = arith.constant 0 : index
    %69 = vector.load %arg7[%c0_90, %c0_91] : memref<16x320xf32, #tpu.memory_space<vmem>>, vector<16x320xf32>
    tpu.vector_store %arg7[%c0_90, %c0_91], %68 {strides = array<i32>} : memref<16x320xf32, #tpu.memory_space<vmem>>, vector<16x320xf32>,
    %c0_92 = arith.constant 0 : index
    %c0_93 = arith.constant 0 : index
    %70 = vector.load %arg7[%c0_92, %c0_93] : memref<16x320xf32, #tpu.memory_space<vmem>>, vector<16x16xf32>
    %c0_94 = arith.constant 0 : index
    %c0_95 = arith.constant 0 : index
    %c0_96 = arith.constant 0 : index
    %71 = vector.load %arg5[%c0_94, %c0_95, %c0_96] : memref<1x16x256xf32, #tpu.memory_space<vmem>>, vector<1x16x16xf32>
    %72 = vector.shape_cast %71 : vector<1x16x16xf32> to vector<16x16xf32>
    %73 = vector.shape_cast %70 : vector<16x16xf32> to vector<1x16x16xf32>
    tpu.vector_store %arg5[%c0_94, %c0_95, %c0_96], %73 {strides = array<i32>} : memref<1x16x256xf32, #tpu.memory_space<vmem>>, vector<1x16x16xf32>,
    %c0_97 = arith.constant 0 : index
    %c20_98 = arith.constant 20 : index
    %74 = vector.load %arg7[%c0_97, %c20_98] : memref<16x320xf32, #tpu.memory_space<vmem>>, vector<16x16xf32>
    %c0_99 = arith.constant 0 : index
    %c0_100 = arith.constant 0 : index
    %c16_101 = arith.constant 16 : index
    %75 = vector.load %arg5[%c0_99, %c0_100, %c16_101] : memref<1x16x256xf32, #tpu.memory_space<vmem>>, vector<1x16x16xf32>
    %76 = vector.shape_cast %75 : vector<1x16x16xf32> to vector<16x16xf32>
    %77 = vector.shape_cast %74 : vector<16x16xf32> to vector<1x16x16xf32>
    tpu.vector_store %arg5[%c0_99, %c0_100, %c16_101], %77 {strides = array<i32>} : memref<1x16x256xf32, #tpu.memory_space<vmem>>, vector<1x16x16xf32>,
    %c0_102 = arith.constant 0 : index
    %c40_103 = arith.constant 40 : index
    %78 = vector.load %arg7[%c0_102, %c40_103] : memref<16x320xf32, #tpu.memory_space<vmem>>, vector<16x16xf32>
    %c0_104 = arith.constant 0 : index
    %c0_105 = arith.constant 0 : index
    %c32_106 = arith.constant 32 : index
    %79 = vector.load %arg5[%c0_104, %c0_105, %c32_106] : memref<1x16x256xf32, #tpu.memory_space<vmem>>, vector<1x16x16xf32>
    %80 = vector.shape_cast %79 : vector<1x16x16xf32> to vector<16x16xf32>
    %81 = vector.shape_cast %78 : vector<16x16xf32> to vector<1x16x16xf32>
    tpu.vector_store %arg5[%c0_104, %c0_105, %c32_106], %81 {strides = array<i32>} : memref<1x16x256xf32, #tpu.memory_space<vmem>>, vector<1x16x16xf32>,
    %c0_107 = arith.constant 0 : index
    %c60_108 = arith.constant 60 : index
    %82 = vector.load %arg7[%c0_107, %c60_108] : memref<16x320xf32, #tpu.memory_space<vmem>>, vector<16x16xf32>
    %c0_109 = arith.constant 0 : index
    %c0_110 = arith.constant 0 : index
    %c48_111 = arith.constant 48 : index
    %83 = vector.load %arg5[%c0_109, %c0_110, %c48_111] : memref<1x16x256xf32, #tpu.memory_space<vmem>>, vector<1x16x16xf32>
    %84 = vector.shape_cast %83 : vector<1x16x16xf32> to vector<16x16xf32>
    %85 = vector.shape_cast %82 : vector<16x16xf32> to vector<1x16x16xf32>
    tpu.vector_store %arg5[%c0_109, %c0_110, %c48_111], %85 {strides = array<i32>} : memref<1x16x256xf32, #tpu.memory_space<vmem>>, vector<1x16x16xf32>,
    %c0_112 = arith.constant 0 : index
    %c80_113 = arith.constant 80 : index
    %86 = vector.load %arg7[%c0_112, %c80_113] : memref<16x320xf32, #tpu.memory_space<vmem>>, vector<16x16xf32>
    %c0_114 = arith.constant 0 : index
    %c0_115 = arith.constant 0 : index
    %c64_116 = arith.constant 64 : index
    %87 = vector.load %arg5[%c0_114, %c0_115, %c64_116] : memref<1x16x256xf32, #tpu.memory_space<vmem>>, vector<1x16x16xf32>
    %88 = vector.shape_cast %87 : vector<1x16x16xf32> to vector<16x16xf32>
    %89 = vector.shape_cast %86 : vector<16x16xf32> to vector<1x16x16xf32>
    tpu.vector_store %arg5[%c0_114, %c0_115, %c64_116], %89 {strides = array<i32>} : memref<1x16x256xf32, #tpu.memory_space<vmem>>, vector<1x16x16xf32>,
    %c0_117 = arith.constant 0 : index
    %c100 = arith.constant 100 : index
    %90 = vector.load %arg7[%c0_117, %c100] : memref<16x320xf32, #tpu.memory_space<vmem>>, vector<16x16xf32>
    %c0_118 = arith.constant 0 : index
    %c0_119 = arith.constant 0 : index
    %c80_120 = arith.constant 80 : index
    %91 = vector.load %arg5[%c0_118, %c0_119, %c80_120] : memref<1x16x256xf32, #tpu.memory_space<vmem>>, vector<1x16x16xf32>
    %92 = vector.shape_cast %91 : vector<1x16x16xf32> to vector<16x16xf32>
    %93 = vector.shape_cast %90 : vector<16x16xf32> to vector<1x16x16xf32>
    tpu.vector_store %arg5[%c0_118, %c0_119, %c80_120], %93 {strides = array<i32>} : memref<1x16x256xf32, #tpu.memory_space<vmem>>, vector<1x16x16xf32>,
    %c0_121 = arith.constant 0 : index
    %c120 = arith.constant 120 : index
    %94 = vector.load %arg7[%c0_121, %c120] : memref<16x320xf32, #tpu.memory_space<vmem>>, vector<16x16xf32>
    %c0_122 = arith.constant 0 : index
    %c0_123 = arith.constant 0 : index
    %c96 = arith.constant 96 : index
    %95 = vector.load %arg5[%c0_122, %c0_123, %c96] : memref<1x16x256xf32, #tpu.memory_space<vmem>>, vector<1x16x16xf32>
    %96 = vector.shape_cast %95 : vector<1x16x16xf32> to vector<16x16xf32>
    %97 = vector.shape_cast %94 : vector<16x16xf32> to vector<1x16x16xf32>
    tpu.vector_store %arg5[%c0_122, %c0_123, %c96], %97 {strides = array<i32>} : memref<1x16x256xf32, #tpu.memory_space<vmem>>, vector<1x16x16xf32>,
    %c0_124 = arith.constant 0 : index
    %c140 = arith.constant 140 : index
    %98 = vector.load %arg7[%c0_124, %c140] : memref<16x320xf32, #tpu.memory_space<vmem>>, vector<16x16xf32>
    %c0_125 = arith.constant 0 : index
    %c0_126 = arith.constant 0 : index
    %c112 = arith.constant 112 : index
    %99 = vector.load %arg5[%c0_125, %c0_126, %c112] : memref<1x16x256xf32, #tpu.memory_space<vmem>>, vector<1x16x16xf32>
    %100 = vector.shape_cast %99 : vector<1x16x16xf32> to vector<16x16xf32>
    %101 = vector.shape_cast %98 : vector<16x16xf32> to vector<1x16x16xf32>
    tpu.vector_store %arg5[%c0_125, %c0_126, %c112], %101 {strides = array<i32>} : memref<1x16x256xf32, #tpu.memory_space<vmem>>, vector<1x16x16xf32>,
    %c0_127 = arith.constant 0 : index
    %c160 = arith.constant 160 : index
    %102 = vector.load %arg7[%c0_127, %c160] : memref<16x320xf32, #tpu.memory_space<vmem>>, vector<16x16xf32>
    %c0_128 = arith.constant 0 : index
    %c0_129 = arith.constant 0 : index
    %c128 = arith.constant 128 : index
    %103 = vector.load %arg5[%c0_128, %c0_129, %c128] : memref<1x16x256xf32, #tpu.memory_space<vmem>>, vector<1x16x16xf32>
    %104 = vector.shape_cast %103 : vector<1x16x16xf32> to vector<16x16xf32>
    %105 = vector.shape_cast %102 : vector<16x16xf32> to vector<1x16x16xf32>
    tpu.vector_store %arg5[%c0_128, %c0_129, %c128], %105 {strides = array<i32>} : memref<1x16x256xf32, #tpu.memory_space<vmem>>, vector<1x16x16xf32>,
    %c0_130 = arith.constant 0 : index
    %c180 = arith.constant 180 : index
    %106 = vector.load %arg7[%c0_130, %c180] : memref<16x320xf32, #tpu.memory_space<vmem>>, vector<16x16xf32>
    %c0_131 = arith.constant 0 : index
    %c0_132 = arith.constant 0 : index
    %c144 = arith.constant 144 : index
    %107 = vector.load %arg5[%c0_131, %c0_132, %c144] : memref<1x16x256xf32, #tpu.memory_space<vmem>>, vector<1x16x16xf32>
    %108 = vector.shape_cast %107 : vector<1x16x16xf32> to vector<16x16xf32>
    %109 = vector.shape_cast %106 : vector<16x16xf32> to vector<1x16x16xf32>
    tpu.vector_store %arg5[%c0_131, %c0_132, %c144], %109 {strides = array<i32>} : memref<1x16x256xf32, #tpu.memory_space<vmem>>, vector<1x16x16xf32>,
    %c0_133 = arith.constant 0 : index
    %c200 = arith.constant 200 : index
    %110 = vector.load %arg7[%c0_133, %c200] : memref<16x320xf32, #tpu.memory_space<vmem>>, vector<16x16xf32>
    %c0_134 = arith.constant 0 : index
    %c0_135 = arith.constant 0 : index
    %c160_136 = arith.constant 160 : index
    %111 = vector.load %arg5[%c0_134, %c0_135, %c160_136] : memref<1x16x256xf32, #tpu.memory_space<vmem>>, vector<1x16x16xf32>
    %112 = vector.shape_cast %111 : vector<1x16x16xf32> to vector<16x16xf32>
    %113 = vector.shape_cast %110 : vector<16x16xf32> to vector<1x16x16xf32>
    tpu.vector_store %arg5[%c0_134, %c0_135, %c160_136], %113 {strides = array<i32>} : memref<1x16x256xf32, #tpu.memory_space<vmem>>, vector<1x16x16xf32>,
    %c0_137 = arith.constant 0 : index
    %c220 = arith.constant 220 : index
    %114 = vector.load %arg7[%c0_137, %c220] : memref<16x320xf32, #tpu.memory_space<vmem>>, vector<16x16xf32>
    %c0_138 = arith.constant 0 : index
    %c0_139 = arith.constant 0 : index
    %c176 = arith.constant 176 : index
    %115 = vector.load %arg5[%c0_138, %c0_139, %c176] : memref<1x16x256xf32, #tpu.memory_space<vmem>>, vector<1x16x16xf32>
    %116 = vector.shape_cast %115 : vector<1x16x16xf32> to vector<16x16xf32>
    %117 = vector.shape_cast %114 : vector<16x16xf32> to vector<1x16x16xf32>
    tpu.vector_store %arg5[%c0_138, %c0_139, %c176], %117 {strides = array<i32>} : memref<1x16x256xf32, #tpu.memory_space<vmem>>, vector<1x16x16xf32>,
    %c0_140 = arith.constant 0 : index
    %c240 = arith.constant 240 : index
    %118 = vector.load %arg7[%c0_140, %c240] : memref<16x320xf32, #tpu.memory_space<vmem>>, vector<16x16xf32>
    %c0_141 = arith.constant 0 : index
    %c0_142 = arith.constant 0 : index
    %c192 = arith.constant 192 : index
    %119 = vector.load %arg5[%c0_141, %c0_142, %c192] : memref<1x16x256xf32, #tpu.memory_space<vmem>>, vector<1x16x16xf32>
    %120 = vector.shape_cast %119 : vector<1x16x16xf32> to vector<16x16xf32>
    %121 = vector.shape_cast %118 : vector<16x16xf32> to vector<1x16x16xf32>
    tpu.vector_store %arg5[%c0_141, %c0_142, %c192], %121 {strides = array<i32>} : memref<1x16x256xf32, #tpu.memory_space<vmem>>, vector<1x16x16xf32>,
    %c0_143 = arith.constant 0 : index
    %c260 = arith.constant 260 : index
    %122 = vector.load %arg7[%c0_143, %c260] : memref<16x320xf32, #tpu.memory_space<vmem>>, vector<16x16xf32>
    %c0_144 = arith.constant 0 : index
    %c0_145 = arith.constant 0 : index
    %c208 = arith.constant 208 : index
    %123 = vector.load %arg5[%c0_144, %c0_145, %c208] : memref<1x16x256xf32, #tpu.memory_space<vmem>>, vector<1x16x16xf32>
    %124 = vector.shape_cast %123 : vector<1x16x16xf32> to vector<16x16xf32>
    %125 = vector.shape_cast %122 : vector<16x16xf32> to vector<1x16x16xf32>
    tpu.vector_store %arg5[%c0_144, %c0_145, %c208], %125 {strides = array<i32>} : memref<1x16x256xf32, #tpu.memory_space<vmem>>, vector<1x16x16xf32>,
    %c0_146 = arith.constant 0 : index
    %c280 = arith.constant 280 : index
    %126 = vector.load %arg7[%c0_146, %c280] : memref<16x320xf32, #tpu.memory_space<vmem>>, vector<16x16xf32>
    %c0_147 = arith.constant 0 : index
    %c0_148 = arith.constant 0 : index
    %c224 = arith.constant 224 : index
    %127 = vector.load %arg5[%c0_147, %c0_148, %c224] : memref<1x16x256xf32, #tpu.memory_space<vmem>>, vector<1x16x16xf32>
    %128 = vector.shape_cast %127 : vector<1x16x16xf32> to vector<16x16xf32>
    %129 = vector.shape_cast %126 : vector<16x16xf32> to vector<1x16x16xf32>
    tpu.vector_store %arg5[%c0_147, %c0_148, %c224], %129 {strides = array<i32>} : memref<1x16x256xf32, #tpu.memory_space<vmem>>, vector<1x16x16xf32>,
    %c0_149 = arith.constant 0 : index
    %c300 = arith.constant 300 : index
    %130 = vector.load %arg7[%c0_149, %c300] : memref<16x320xf32, #tpu.memory_space<vmem>>, vector<16x16xf32>
    %c0_150 = arith.constant 0 : index
    %c0_151 = arith.constant 0 : index
    %c240_152 = arith.constant 240 : index
    %131 = vector.load %arg5[%c0_150, %c0_151, %c240_152] : memref<1x16x256xf32, #tpu.memory_space<vmem>>, vector<1x16x16xf32>
    %132 = vector.shape_cast %131 : vector<1x16x16xf32> to vector<16x16xf32>
    %133 = vector.shape_cast %130 : vector<16x16xf32> to vector<1x16x16xf32>
    tpu.vector_store %arg5[%c0_150, %c0_151, %c240_152], %133 {strides = array<i32>} : memref<1x16x256xf32, #tpu.memory_space<vmem>>, vector<1x16x16xf32>,
    return
  }
  func.func @transform_0(%arg0: i32, %arg1: i32) -> (i32, i32, i32, i32) {
    %c0_i32 = arith.constant 0 : i32
    %c0_i32_0 = arith.constant 0 : i32
    %c0_i32_1 = arith.constant 0 : i32
    return %arg0, %arg1, %c0_i32, %c0_i32_0 : i32, i32, i32, i32
  }
  func.func @transform_1(%arg0: i32, %arg1: i32) -> (i32, i32) {
    %c0_i32 = arith.constant 0 : i32
    %c0_i32_0 = arith.constant 0 : i32
    %c0_i32_1 = arith.constant 0 : i32
    return %c0_i32, %c0_i32_0 : i32, i32
  }
  func.func @transform_2(%arg0: i32, %arg1: i32) -> (i32, i32) {
    %c0_i32 = arith.constant 0 : i32
    %c0_i32_0 = arith.constant 0 : i32
    %c0_i32_1 = arith.constant 0 : i32
    return %c0_i32, %c0_i32_0 : i32, i32
  }
  func.func @transform_3(%arg0: i32, %arg1: i32) -> (i32, i32, i32) {
    %c0_i32 = arith.constant 0 : i32
    %c0_i32_0 = arith.constant 0 : i32
    return %arg0, %c0_i32, %arg1 : i32, i32, i32
  }
}

</mosaic_0001>

<bundles_post_ra>
// kernel: combind_conv2d_forward.1
= control target key start
LH: loop header
LB: loop body
LE: loop exit
PB: predicated region body
PF: predicated region fallthrough
CT: control target
= control target key end

     0   :  { %s1861_s12 = smov 0   ;;  %s1863_s13 = smov 0   ;;  %s2541_s0 = inlined_call_operand.vmem [shape: bf16[2,1,3,420], index: 0, kind: input, shape index: {}]   ;;  %s2542_s1 = inlined_call_operand.vmem [shape: bf16[16,80], index: 1, kind: input, shape index: {}]   ;;  %s2543_s2 = inlined_call_operand.vmem [shape: f32[16,1], index: 2, kind: input, shape index: {}]   ;;  %s2544_s3 = inlined_call_operand.vmem [shape: f32[2,16,256], index: 3, kind: output, shape index: {}]  }
   0x1   :  { %s1865_s14 = smov 0  }
   0x2 LB: > { %s25_s15 = sadd.s32 1, %s1812_s13  ;;  %p1666_p0 = scmp.ge.s32.totalorder %s1816_s14, 1  ;;  %s1816_s14 = sphi %s1865_s14, %s13_s14   ;;  %s1812_s13 = sphi %s1863_s13, %s2552_s13   ;;  %s1808_s12 = sphi %s1861_s12, %s2551_s12  }
   0x3   : > { %p27_p1 = scmp.ge.s32.totalorder %s25_s15, 2  ;;  %p157_p2 = scmp.lt.s32.totalorder %s1816_s14, 3 }
   0x5   : > { %s2554_s15 = smov (%p27_p1, %s25_s15), 0  ;;  %p158_p3 = pnand %p1666_p0, %p157_p2 }
   0x6   : > { %p189_p4 = scmp.lt.s32.totalorder (!%p158_p3), %s1808_s12, 1  ;;  %s1819_s20 = smov (!%p158_p3), 88  }
   0x7   : > { %161 = sbr.rel (%p158_p3) target bundleno = 813 (0x32d), region = 32  ;;  %s1820_s21 = smov (!%p158_p3), 108  }
   0x8   : > { %s1821_s22 = smov (!%p158_p3), 48   ;;  %s1822_s23 = smov (!%p158_p3), 68  }
   0x9   : > { %s1824_s24 = smov (!%p158_p3), 124   ;;  %s1825_s25 = smov (!%p158_p3), 125  }
   0xa   : > { %s1826_s26 = smov (!%p158_p3), 126   ;;  %s1827_s27 = smov (!%p158_p3), 127  }
   0xb   : > { %s1830_s11 = smov (!%p158_p3), 76   ;;  %s1833_s17 = smov (!%p158_p3), 96  }
   0xc   : > { %v216_v0 = vlaneseq  ;;  %v1818_v1 = vmov 1983009808   ;;  %s2556_s12 = smov (!%p189_p4, %s1808_s12), 1  ;;  %vm330_vm0 = vcmask 1041408   ;;  %vm331_vm1 = vsmask.f32 1280 }
   0xd   : > { %v214_v2 = vunpack.c.l.s4 %v1818_v1  ;;  %s1711_s16 = sshll.u32 %s2556_s12, 3  ;;  %vm2110_vm2 = vmand %vm330_vm0, %vm331_vm1  ;;  %vm349_vm3 = vcmask 1044480   ;;  %vm350_vm4 = vsmask.f32 4352  ;;  %vm336_vm5 = vcmask 1042432   ;;  %s1712_s7 = sshll.u32 %s2556_s12, 5 }
   0xe   : > { %v217_v3 = vshrl.u32 %v216_v0, 7  ;;  %s1885_s19 = scalar_lea.vmem %s2541_s0, %s1711_s16  ;;  %vm2122_vm6 = vmand %vm349_vm3, %vm350_vm4  ;;  %vm368_vm7 = vcmask 1047552   ;;  %vm369_vm8 = vsmask.f32 7424  ;;  %vm326_vm9 = vcmask 392192   ;;  %s2456_s10 = scalar_lea.vmem %s2544_s3, %s1712_s7 }
   0xf   : > { %v215_v4 = vunpack.c.0.s8 %v214_v2  ;;  %v961_v6 = vld [vmem:[%s1885_s19] sm:$0x3f]  ;;  %vm355_vm10 = vcmask 1045504   ;;  %vm2134_vm11 = vmand %vm368_vm7, %vm369_vm8  ;;  %vm261_vm12 = vcmask 883712   ;;  %vm276_vm13 = vcmask 719872   ;;  %s1831_s12 = smov 72  }
  0x10   : > { %v962_v7 = vld [vmem:[%s1885_s19] sm:$0xff]  ;;  %v964_v9 = vcombine.high %v961_v6, %v961_v6  ;;  %vm294_vm14 = vcmask 556032   ;;  %vm392_vm15 = vcmask 519168   ;;  %vm1829_vm0 = vmmov 0   ;;  %s1832_s16 = smov 120   ;;  %s1834_s18 = smov 116  }
  0x11   : > { %v1887_v5 = vsub.s32 %v215_v4, %v217_v3  ;;  %v1050_v10 = vcombine.low %v962_v7, %v962_v7  ;;  %v773_v31 = vld [vmem:[%s1885_s19] sm:$0x3f]  ;;  %vm571_vm1 = vcmask 1043456   ;;  %vm573_vm3 = vcmask 1039360   ;;  %s1840_s28 = smov 100  }
  0x12   : > { %v776_v39 = vcombine.high %v773_v31, %v773_v31  ;;  %v585_v3 = vld [vmem:[%s1885_s19] sm:$0x3f]  ;;  %vm1137_vm4 = vcmask 1014784   ;;  %vm949_vm7 = vcmask 1022976   ;;  %vm761_vm8 = vcmask 1031168  }
  0x13   : > { %v1892_v8 = vrot.slane %v961_v6, %v1887_v5  ;;  %v1900_v13 = vrot.slane %v964_v9, %v1887_v5  ;;  %v1908_v19 = vrot.slane %v1050_v10, %v1887_v5  ;;  %v1923_v35 = vrot.slane %v773_v31, %v1887_v5 }
  0x14   : > { %v1929_v43 = vrot.slane %v962_v7, %v1887_v5  ;;  %v1935_v47 = vrot.slane %v776_v39, %v1887_v5  ;;  %v1966_v10 = vrot.slane %v585_v3, %v1887_v5 }
  0x15   : > { %v1018_v11 = vrot.slane %v1892_v8, 5  ;;  %v1897_v12 = vcombine.high %v1892_v8, %v1892_v8  ;;  %v984_v14 = vshrl.u32 %v1892_v8, 16  ;;  %v987_v15 = vshll.u32 %v1892_v8, 16 }
  0x16   : > { %v1020_v17 = vrot.slane %v1900_v13, 5  ;;  %v1000_v22 = vshrl.u32 %v1900_v13, 16  ;;  %v1003_v24 = vshll.u32 %v1900_v13, 16  ;;  %v1918_v28 = vcombine.low %v1908_v19, %v1908_v19 }
  0x17   : > { %1021 = vrot.lane.b32.xlu1 %v1018_v11, %s1819_s20  ;;  %v1019_v16 = vrot.slane %v1897_v12, 5  ;;  %v986_v18 = vrot.slane %v984_v14, 6  ;;  %v989_v20 = vrot.slane %v987_v15, 7  ;;  %v1029_v21 = vrot.slane %v984_v14, 3 }
  0x18   : > { %v1030_v23 = vrot.slane %v987_v15, 4  ;;  %v992_v25 = vshrl.u32 %v1897_v12, 16  ;;  %v995_v26 = vshll.u32 %v1897_v12, 16  ;;  %v1002_v29 = vrot.slane %v1000_v22, 6 }
  0x19   : > { %1023 = vrot.lane.b32.xlu0 %v1019_v16, %s1819_s20  ;;  %v990_v27 = vor.u32 %v989_v20, %v986_v18  ;;  %v1005_v30 = vrot.slane %v1003_v24, 7  ;;  %v1035_v41 = vrot.slane %v1000_v22, 3  ;;  %v1036_v42 = vrot.slane %v1003_v24, 4 }
  0x1a   : > { %v1031_v32 = vor.u32 %v1030_v23, %v1029_v21  ;;  %v994_v33 = vrot.slane %v992_v25, 6  ;;  %v997_v34 = vrot.slane %v995_v26, 7  ;;  %v1032_v37 = vrot.slane %v992_v25, 3 }
  0x1b   : > { %1025 = vrot.lane.b32.xlu1 %v1020_v17, %s1819_s20  ;;  %v1006_v36 = vor.u32 %v1005_v30, %v1002_v29  ;;  %v1033_v38 = vrot.slane %v995_v26, 4  ;;  %v796_v45 = vshrl.u32 %v1923_v35, 16  ;;  %v799_v46 = vshll.u32 %v1923_v35, 16 }
  0x1c   : > { %v998_v40 = vor.u32 %v997_v34, %v994_v33  ;;  %v1037_v48 = vor.u32 %v1036_v42, %v1035_v41  ;;  %v1940_v49 = vcombine.high %v1923_v35, %v1923_v35  ;;  %v1944_v50 = vcombine.low %v1929_v43, %v1929_v43 }
  0x1d   : > { %1007 = vrot.lane.b32.xlu0 %v990_v27, %s1820_s21  ;;  %v1034_v44 = vor.u32 %v1033_v38, %v1032_v37  ;;  %v798_v51 = vrot.slane %v796_v45, 6  ;;  %v801_v52 = vrot.slane %v799_v46, 7  ;;  %v812_v53 = vshrl.u32 %v1935_v47, 16 }
  0x1e   : > { %v815_v54 = vshll.u32 %v1935_v47, 16  ;;  %v804_v55 = vshrl.u32 %v1940_v49, 16  ;;  %v807_v56 = vshll.u32 %v1940_v49, 16  ;;  %v831_v0 = vrot.slane %v1940_v49, 5 }
  0x1f   : > { %1067 = vrot.lane.b32.xlu1 %v1918_v28, %s1821_s22  ;;  %v802_v57 = vor.u32 %v801_v52, %v798_v51  ;;  %v814_v58 = vrot.slane %v812_v53, 6  ;;  %v841_v1 = vrot.slane %v796_v45, 3  ;;  %v842_v2 = vrot.slane %v799_v46, 4 }
  0x20   : > { %v817_v59 = vrot.slane %v815_v54, 7  ;;  %v806_v60 = vrot.slane %v804_v55, 6  ;;  %v809_v61 = vrot.slane %v807_v56, 7  ;;  %v830_v4 = vrot.slane %v1923_v35, 5 }
  0x21   : > { %1038 = vrot.lane.b32.xlu0 %v1031_v32, %s1822_s23  ;;  %v843_v6 = vor.u32 %v842_v2, %v841_v1  ;;  %v847_v7 = vrot.slane %v812_v53, 3  ;;  %v848_v9 = vrot.slane %v815_v54, 4  ;;  %v832_v11 = vrot.slane %v1935_v47, 5 }
  0x22   : > { %v818_v62 = vor.u32 %v817_v59, %v814_v58  ;;  %v810_v63 = vor.u32 %v809_v61, %v806_v60  ;;  %v844_v14 = vrot.slane %v804_v55, 3  ;;  %v845_v15 = vrot.slane %v807_v56, 4 }
  0x23   : > { %1011 = vrot.lane.b32.xlu1 %v1006_v36, %s1820_s21  ;;  %v849_v16 = vor.u32 %v848_v9, %v847_v7  ;;  %v1973_v17 = vcombine.high %v1966_v10, %v1966_v10  ;;  %v588_v20 = vcombine.high %v585_v3, %v585_v3  ;;  %v608_v23 = vshrl.u32 %v1966_v10, 16 }
  0x24   : > { %v846_v18 = vor.u32 %v845_v15, %v844_v14  ;;  %v611_v24 = vshll.u32 %v1966_v10, 16  ;;  %v642_v38 = vrot.slane %v1966_v10, 5 }
  0x25   : > { %1009 = vrot.lane.b32.xlu0 %v998_v40, %s1820_s21  ;;  %v616_v21 = vshrl.u32 %v1973_v17, 16  ;;  %v619_v22 = vshll.u32 %v1973_v17, 16  ;;  %v1983_v25 = vrot.slane %v588_v20, %v1887_v5  ;;  %v610_v29 = vrot.slane %v608_v23, 6 }
  0x26   : > { %v613_v30 = vrot.slane %v611_v24, 7  ;;  %v643_v45 = vrot.slane %v1973_v17, 5  ;;  %v653_v46 = vrot.slane %v608_v23, 3 }
  0x27   : > { %1040 = vrot.lane.b32.xlu1 %v1034_v44, %s1822_s23  ;;  %v618_v26 = vrot.slane %v616_v21, 6  ;;  %v621_v27 = vrot.slane %v619_v22, 7  ;;  %v624_v31 = vshrl.u32 %v1983_v25, 16  ;;  %v627_v32 = vshll.u32 %v1983_v25, 16  ;;  %v396_v44 = vld [vmem:[%s1885_s19] sm:$0x3f] }
  0x28   : > { %v614_v34 = vor.u32 %v613_v30, %v610_v29  ;;  %v644_v40 = vrot.slane %v1983_v25, 5  ;;  %v656_v41 = vrot.slane %v616_v21, 3  ;;  %v657_v42 = vrot.slane %v619_v22, 4  ;;  %v209_v21 = vld [vmem:[%s1885_s19] sm:$0x3f]  ;;  %s1835_s19 = smov 104  }
  0x29   : > { %1042 = vrot.lane.b32.xlu0 %v1037_v48, %s1822_s23  ;;  %v622_v33 = vor.u32 %v621_v27, %v618_v26  ;;  %v626_v36 = vrot.slane %v624_v31, 6  ;;  %v629_v37 = vrot.slane %v627_v32, 7  ;;  %v654_v48 = vrot.slane %v611_v24, 4 }
  0x2a   : > { %v658_v51 = vor.u32 %v657_v42, %v656_v41  ;;  %v2005_v52 = vrot.slane %v396_v44, %v1887_v5  ;;  %v399_v53 = vcombine.high %v396_v44, %v396_v44  ;;  %v659_v55 = vrot.slane %v624_v31, 3 }
  0x2b   : > { %1071 = vrot.lane.b32.xlu1 %v1944_v50, %s1821_s22  ;;  %v630_v39 = vor.u32 %v629_v37, %v626_v36  ;;  %v655_v54 = vor.u32 %v654_v48, %v653_v46  ;;  %v660_v56 = vrot.slane %v627_v32, 4  ;;  %v2040_v27 = vrot.slane %v209_v21, %v1887_v5 }
  0x2c   : > { %v422_v58 = vshll.u32 %v2005_v52, 16  ;;  %v2012_v59 = vrot.slane %v399_v53, %v1887_v5  ;;  %v2017_v61 = vcombine.high %v2005_v52, %v2005_v52  ;;  %v453_v22 = vrot.slane %v2005_v52, 5 }
  0x2d   : > { %1069 = vrot.lane.b32.xlu0 %v1908_v19, %s1821_s22  ;;  %v661_v60 = vor.u32 %v660_v56, %v659_v55  ;;  %v212_v36 = vcombine.high %v209_v21, %v209_v21  ;;  %v267_v56 = vrot.slane %v2040_v27, 5 }
  0x2e   : > { %v438_v1 = vshll.u32 %v2012_v59, 16  ;;  %v427_v2 = vshrl.u32 %v2017_v61, 16  ;;  %v430_v3 = vshll.u32 %v2017_v61, 16  ;;  %v465_v20 = vrot.slane %v422_v58, 4 }
  0x2f   : > { %819 = vrot.lane.b32.xlu1 %v802_v57, %s1820_s21  ;;  %v419_v57 = vshrl.u32 %v2005_v52, 16  ;;  %v455_v29 = vrot.slane %v2012_v59, 5  ;;  %v2057_v41 = vrot.slane %v212_v36, %v1887_v5 }
  0x30   : > { %v440_v7 = vrot.slane %v438_v1, 7  ;;  %v429_v9 = vrot.slane %v427_v2, 6  ;;  %v471_v26 = vrot.slane %v438_v1, 4  ;;  %v467_v30 = vrot.slane %v427_v2, 3 }
  0x31   : > { %1073 = vrot.lane.b32.xlu0 %v1929_v43, %s1821_s22  ;;  %v468_v31 = vrot.slane %v430_v3, 4  ;;  %v248_v48 = vshrl.u32 %v2057_v41, 16 }
  0x33   : > { %823 = vrot.lane.b32.xlu1 %v818_v62, %s1820_s21  ;;  %v421_v62 = vrot.slane %v419_v57, 6 }
  0x35   : > { %821 = vrot.lane.b32.xlu0 %v810_v63, %s1820_s21  ;;  %v424_v63 = vrot.slane %v422_v58, 7 }
  0x37   : > { %835 = vrot.lane.b32.xlu1 %v831_v0, %s1819_s20  ;;  %v435_v0 = vshrl.u32 %v2012_v59, 16 }
  0x39   : > { %833 = vrot.lane.b32.xlu0 %v830_v4, %s1819_s20  ;;  %v425_v4 = vor.u32 %v424_v63, %v421_v62  ;;  %v470_v24 = vrot.slane %v435_v0, 3 }
  0x3b   : > { %850 = vrot.lane.b32.xlu1 %v843_v6, %s1822_s23  ;;  %v437_v6 = vrot.slane %v435_v0, 6  ;;  %v472_v32 = vor.u32 %v471_v26, %v470_v24 }
  0x3d   : > { %837 = vrot.lane.b32.xlu0 %v832_v11, %s1819_s20  ;;  %v432_v11 = vrot.slane %v430_v3, 7  ;;  %v441_v14 = vor.u32 %v440_v7, %v437_v6 }
  0x3f   : > { %854 = vrot.lane.b32.xlu1 %v849_v16, %s1822_s23  ;;  %v433_v15 = vor.u32 %v432_v11, %v429_v9  ;;  %v454_v16 = vrot.slane %v2017_v61, 5  ;;  %v2102_v11 = vrot.slane %v248_v48, 3 }
  0x41   : > { %852 = vrot.lane.b32.xlu0 %v846_v18, %s1822_s23  ;;  %v464_v18 = vrot.slane %v419_v57, 3 }
  0x43   : > { %881 = vrot.lane.b32.xlu1 %v1908_v19, %s1821_s22  ;;  %v466_v23 = vor.u32 %v465_v20, %v464_v18 }
  0x45   : > { %879 = vrot.lane.b32.xlu0 %v1918_v28, %s1821_s22 }
  0x47   : > { %885 = vrot.lane.b32.xlu1 %v1929_v43, %s1821_s22 }
  0x49   : > { %883 = vrot.lane.b32.xlu0 %v1944_v50, %s1821_s22 }
  0x4b   : > { %633 = vrot.lane.b32.xlu1 %v622_v33, %s1820_s21  ;;  %v2047_v33 = vcombine.high %v2040_v27, %v2040_v27 }
  0x4d   : > { %631 = vrot.lane.b32.xlu0 %v614_v34, %s1820_s21  ;;  %v469_v34 = vor.u32 %v468_v31, %v467_v30  ;;  %v240_v37 = vshrl.u32 %v2047_v33, 16 }
  0x4f   : > { %645 = vrot.lane.b32.xlu1 %v642_v38, %s1819_s20  ;;  %v243_v38 = vshll.u32 %v2047_v33, 16  ;;  %v242_v42 = vrot.slane %v240_v37, 6 }
  0x51   : > { %635 = vrot.lane.b32.xlu0 %v630_v39, %s1820_s21  ;;  %v232_v39 = vshrl.u32 %v2040_v27, 16  ;;  %v245_v44 = vrot.slane %v243_v38, 7 }
  0x53   : > { %649 = vrot.lane.b32.xlu1 %v644_v40, %s1819_s20  ;;  %v235_v40 = vshll.u32 %v2040_v27, 16  ;;  %v246_v5 = vor.u32 %v245_v44, %v242_v42  ;;  %v2092_v3 = vrot.slane %v232_v39, 3 }
  0x55   : > { %647 = vrot.lane.b32.xlu0 %v643_v45, %s1819_s20  ;;  %v234_v45 = vrot.slane %v232_v39, 6  ;;  %v237_v46 = vrot.slane %v235_v40, 7  ;;  %v1823_v39 = vmov 0.0  }
  0x56   : > { %1719 = vmatprep.subr.bf16.mxu1 %v1823_v39  ;;  %1729 = vmatprep.mubr.msk.bf16.mxu1 %vm1829_vm0, %v1823_v39  ;;  %vm1473_vm0 = vcmask 1048448  }
  0x57   : > { %664 = vrot.lane.b32.xlu1 %v658_v51, %s1822_s23  ;;  %v251_v51 = vshll.u32 %v2057_v41, 16  ;;  %v238_v53 = vor.u32 %v237_v46, %v234_v45 }
  0x59   : > { %662 = vrot.lane.b32.xlu0 %v655_v54, %s1822_s23  ;;  %v250_v54 = vrot.slane %v248_v48, 6  ;;  %v253_v55 = vrot.slane %v251_v51, 7 }
  0x5b   : > { %691 = vrot.lane.b32.xlu1 %v1918_v28, %s1821_s22  ;;  %v254_v57 = vor.u32 %v253_v55, %v250_v54 }
  0x5d   : > { %666 = vrot.lane.b32.xlu0 %v661_v60, %s1822_s23 }
  0x5f   : > { %695 = vrot.lane.b32.xlu1 %v1944_v50, %s1821_s22 }
  0x61   : > { %693 = vrot.lane.b32.xlu0 %v1908_v19, %s1821_s22 }
  0x63   : > { %442 = vrot.lane.b32.xlu1 %v425_v4, %s1820_s21  ;;  %v2094_v4 = vrot.slane %v235_v40, 4 }
  0x65   : > { %697 = vrot.lane.b32.xlu0 %v1929_v43, %s1821_s22  ;;  %v281_v7 = vor.u32 %v2094_v4, %v2092_v3  ;;  %v1171_v4 = vld [vmem:[%s2543_s2] sm:$0xff] }
  0x67   : > { %446 = vrot.lane.b32.xlu1 %v441_v14, %s1820_s21  ;;  %v2104_v14 = vrot.slane %v251_v51, 4 }
  0x69   : > { %444 = vrot.lane.b32.xlu0 %v433_v15, %s1820_s21 }
  0x6b   : > { %458 = vrot.lane.b32.xlu1 %v454_v16, %s1819_s20  ;;  %v287_v16 = vor.u32 %v2104_v14, %v2102_v11 }
  0x6d   : > { %456 = vrot.lane.b32.xlu0 %v453_v22, %s1819_s20 }
  0x6f   : > { %473 = vrot.lane.b32.xlu1 %v466_v23, %s1822_s23 }
  0x71   : > { %460 = vrot.lane.b32.xlu0 %v455_v29, %s1819_s20 }
  0x73   : > { %477 = vrot.lane.b32.xlu1 %v472_v32, %s1822_s23 }
  0x75   : > { %475 = vrot.lane.b32.xlu0 %v469_v34, %s1822_s23 }
  0x77   : > { %504 = vrot.lane.b32.xlu1 %v1908_v19, %s1821_s22 }
  0x79   : > { %502 = vrot.lane.b32.xlu0 %v1918_v28, %s1821_s22 }
  0x7b   : > { %508 = vrot.lane.b32.xlu1 %v1929_v43, %s1821_s22 }
  0x7d   : > { %506 = vrot.lane.b32.xlu0 %v1944_v50, %s1821_s22 }
  0x7f   : > { %257 = vrot.lane.b32.xlu1 %v246_v5, %s1820_s21 }
  0x81   : > { %255 = vrot.lane.b32.xlu0 %v238_v53, %s1820_s21 }
  0x83   : > { %270 = vrot.lane.b32.xlu1 %v267_v56, %s1819_s20 }
  0x85   : > { %259 = vrot.lane.b32.xlu0 %v254_v57, %s1820_s21 }
  0x89   : > { %v2078_v58 = vpop.permute.xlu1 %1021 }
  0x8b   : > { %v2080_v60 = vpop.permute.xlu0 %1023 }
  0x8d   : > { %v2082_v62 = vpop.permute.xlu1 %1025 }
  0x8f   : > { %v2084_v63 = vpop.permute.xlu0 %1007 }
  0x91   : > { %v2086_v0 = vpop.permute.xlu1 %1067 }
  0x93   : > { %v2088_v1 = vpop.permute.xlu0 %1038 }
  0x95   : > { %v2090_v2 = vpop.permute.xlu1 %1011 }
  0x96   : > { %v1080_v22 = vsel %vm2110_vm2, %v1900_v13, %v2090_v2 }
  0x97   : > { %v2096_v6 = vpop.permute.xlu0 %1009  ;;  %v1091_v26 = vsel %vm336_vm5, %v1080_v22, %v2082_v62 }
  0x99   : > { %v2100_v9 = vpop.permute.xlu1 %1040 }
  0x9b   : > { %v2106_v15 = vpop.permute.xlu0 %1042 }
  0x9c   : > { %v1095_v30 = vsel %vm2122_vm6, %v1091_v26, %v2106_v15 }
  0x9d   : > { %v2114_v20 = vpop.permute.xlu1 %1071 }
  0x9f   : > { %v2116_v21 = vpop.permute.xlu0 %1069 }
  0xa1   : > { %v820_v24 = vpop.permute.xlu1 %819 }
  0xa3   : > { %v1074_v29 = vpop.permute.xlu0 %1073 }
  0xa4   : > { %v1077_v13 = vsel %vm326_vm9, %v2114_v20, %v1074_v29 }
  0xa5   : > { %v1106_v31 = vsel %vm355_vm10, %v1095_v30, %v1077_v13  ;;  %v824_v32 = vpop.permute.xlu1 %823 }
  0xa6   : > { %v1110_v36 = vsel %vm2134_vm11, %v1106_v31, 0 }
  0xa7   : > { %v822_v40 = vpop.permute.xlu0 %821  ;;  %v1688_v42 = vcombine.low %v1110_v36, %v1110_v36  ;;  %v1690_v46 = vcombine.high %v1110_v36, %v1110_v36 }
  0xa8   : > { %v825_v5 = vsel %vm261_vm12, %v820_v24, %v822_v40  ;;  %v826_v53 = vsel %vm261_vm12, %v822_v40, %v824_v32 }
  0xa9   : > { %v836_v44 = vpop.permute.xlu1 %835  ;;  %1126 = vrot.lane.b32.xlu1 %v1688_v42, %s1824_s24  ;;  %v890_v57 = vsel %vm2110_vm2, %v1923_v35, %v825_v5  ;;  %v891_v22 = vsel %vm2110_vm2, %v1940_v49, %v826_v53  ;;  %v892_v49 = vsel %vm2110_vm2, %v1935_v47, %v824_v32 }
  0xab   : > { %v834_v45 = vpop.permute.xlu0 %833 }
  0xac   : > { %v839_v54 = vsel %vm276_vm13, %v834_v45, %v836_v44 }
  0xad   : > { %v851_v48 = vpop.permute.xlu1 %850  ;;  %1130 = vrot.lane.b32.xlu1 %v1690_v46, %s1824_s24  ;;  %v895_v29 = vsel %vm336_vm5, %v890_v57, %v839_v54 }
  0xaf   : > { %v838_v51 = vpop.permute.xlu0 %837 }
  0xb0   : > { %v840_v55 = vsel %vm276_vm13, %v836_v44, %v838_v51  ;;  %v903_v44 = vsel %vm336_vm5, %v892_v49, %v838_v51 }
  0xb1   : > { %v855_v56 = vpop.permute.xlu1 %854  ;;  %v899_v24 = vsel %vm336_vm5, %v891_v22, %v840_v55 }
  0xb2   : > { %v907_v5 = vsel %vm2122_vm6, %v903_v44, %v855_v56 }
  0xb3   : > { %v853_v26 = vpop.permute.xlu0 %852 }
  0xb4   : > { %v856_v30 = vsel %vm294_vm14, %v851_v48, %v853_v26  ;;  %v857_v13 = vsel %vm294_vm14, %v853_v26, %v855_v56 }
  0xb5   : > { %v905_v31 = vsel %vm2122_vm6, %v895_v29, %v856_v30  ;;  %v906_v36 = vsel %vm2122_vm6, %v899_v24, %v857_v13  ;;  %v882_v35 = vpop.permute.xlu1 %881 }
  0xb7   : > { %v880_v40 = vpop.permute.xlu0 %879 }
  0xb8   : > { %v887_v42 = vsel %vm326_vm9, %v880_v40, %v882_v35 }
  0xb9   : > { %v910_v45 = vsel %vm355_vm10, %v905_v31, %v887_v42  ;;  %v886_v46 = vpop.permute.xlu1 %885 }
  0xba   : > { %v2177_v51 = vsel %vm2134_vm11, %v910_v45, 0 }
  0xbb   : > { %v884_v48 = vpop.permute.xlu0 %883 }
  0xbc   : > { %v888_v53 = vsel %vm326_vm9, %v882_v35, %v884_v48  ;;  %v889_v54 = vsel %vm326_vm9, %v884_v48, %v886_v46 }
  0xbd   : > { %v914_v55 = vsel %vm355_vm10, %v906_v36, %v888_v53  ;;  %v918_v57 = vsel %vm355_vm10, %v907_v5, %v889_v54  ;;  %v634_v47 = vpop.permute.xlu1 %633 }
  0xbe   : > { %v922_v32 = vsel %vm2134_vm11, %v918_v57, 0  ;;  %v2181_v22 = vsel %vm2134_vm11, %v914_v55, 0 }
  0xbf   : > { %v632_v56 = vpop.permute.xlu0 %631  ;;  %v1684_v26 = vcombine.low %v922_v32, %v922_v32  ;;  %v1683_v29 = vcombine.low %v2177_v51, %v2181_v22  ;;  %v1685_v24 = vcombine.high %v2177_v51, %v2181_v22  ;;  %v1686_v36 = vcombine.high %v922_v32, %v922_v32 }
  0xc0   : > { %v637_v30 = vsel %vm261_vm12, %v632_v56, %v634_v47  ;;  %v1828_v51 = vmov 0  }
  0xc1   : > { %v646_v13 = vpop.permute.xlu1 %645  ;;  %938 = vrot.lane.b32.xlu1 %v1684_v26, %s1825_s25  ;;  %v702_v42 = vsel %vm2110_vm2, %v1966_v10, %v637_v30  ;;  %1304 = vmatprep.mubr.bf16.mxu0 %v1828_v51 }
  0xc2   : > { %1780 = vset.pattern.permute.xlu1 %v1828_v51  ;;  %1781 = vset.pattern.permute.xlu0 %v1828_v51 }
  0xc3   : > { %v636_v31 = vpop.permute.xlu0 %635 }
  0xc4   : > { %v638_v35 = vsel %vm261_vm12, %v634_v47, %v636_v31  ;;  %v704_v10 = vsel %vm2110_vm2, %v1983_v25, %v636_v31 }
  0xc5   : > { %v650_v40 = vpop.permute.xlu1 %649  ;;  %942 = vrot.lane.b32.xlu1 %v1686_v36, %s1825_s25  ;;  %v703_v32 = vsel %vm2110_vm2, %v1973_v17, %v638_v35 }
  0xc7   : > { %v648_v49 = vpop.permute.xlu0 %647 }
  0xc8   : > { %v651_v44 = vsel %vm276_vm13, %v646_v13, %v648_v49  ;;  %v652_v54 = vsel %vm276_vm13, %v648_v49, %v650_v40 }
  0xc9   : > { %v707_v45 = vsel %vm336_vm5, %v702_v42, %v651_v44  ;;  %v665_v46 = vpop.permute.xlu1 %664  ;;  %v711_v56 = vsel %vm336_vm5, %v703_v32, %v652_v54  ;;  %v715_v44 = vsel %vm336_vm5, %v704_v10, %v650_v40 }
  0xcb   : > { %v663_v48 = vpop.permute.xlu0 %662 }
  0xcc   : > { %v668_v55 = vsel %vm294_vm14, %v663_v48, %v665_v46 }
  0xcd   : > { %v692_v5 = vpop.permute.xlu1 %691  ;;  %v717_v30 = vsel %vm2122_vm6, %v707_v45, %v668_v55 }
  0xcf   : > { %v667_v53 = vpop.permute.xlu0 %666 }
  0xd0   : > { %v669_v57 = vsel %vm294_vm14, %v665_v46, %v667_v53 }
  0xd1   : > { %v696_v47 = vpop.permute.xlu1 %695  ;;  %v718_v13 = vsel %vm2122_vm6, %v711_v56, %v669_v57 }
  0xd3   : > { %v694_v26 = vpop.permute.xlu0 %693 }
  0xd4   : > { %v699_v36 = vsel %vm326_vm9, %v692_v5, %v694_v26  ;;  %v700_v49 = vsel %vm326_vm9, %v694_v26, %v696_v47  ;;  %v719_v5 = vsel %vm2122_vm6, %v715_v44, %v667_v53 }
  0xd5   : > { %v722_v42 = vsel %vm355_vm10, %v717_v30, %v699_v36  ;;  %v726_v17 = vsel %vm355_vm10, %v718_v13, %v700_v49  ;;  %v443_v35 = vpop.permute.xlu1 %442  ;;  %v1013_v49 = vsel %vm261_vm12, %v2084_v63, %v2096_v6 }
  0xd6   : > { %v2216_v25 = vsel %vm2134_vm11, %v722_v42, 0  ;;  %v2220_v31 = vsel %vm2134_vm11, %v726_v17, 0 }
  0xd7   : > { %v698_v45 = vpop.permute.xlu0 %697  ;;  %v1679_v46 = vcombine.low %v2216_v25, %v2220_v31  ;;  %v1681_v48 = vcombine.high %v2216_v25, %v2220_v31 }
  0xd8   : > { %v701_v54 = vsel %vm326_vm9, %v696_v47, %v698_v45  ;;  %v1014_v45 = vsel %vm261_vm12, %v2096_v6, %v2090_v2 }
  0xd9   : > { %v730_v55 = vsel %vm355_vm10, %v719_v5, %v701_v54  ;;  %v447_v57 = vpop.permute.xlu1 %446  ;;  %v1078_v5 = vsel %vm2110_vm2, %v1892_v8, %v1013_v49  ;;  %v1027_v8 = vsel %vm276_vm13, %v2078_v58, %v2080_v60 }
  0xda   : > { %v734_v32 = vsel %vm2134_vm11, %v730_v55, 0  ;;  %v515_v63 = vsel %vm2110_vm2, %v2012_v59, %v447_v57  ;;  %v1028_v59 = vsel %vm276_vm13, %v2080_v60, %v2082_v62 }
  0xdb   : > { %v445_v56 = vpop.permute.xlu0 %444  ;;  %v1680_v40 = vcombine.low %v734_v32, %v734_v32  ;;  %v1682_v30 = vcombine.high %v734_v32, %v734_v32 }
  0xdc   : > { %v448_v42 = vsel %vm261_vm12, %v443_v35, %v445_v56  ;;  %v449_v54 = vsel %vm261_vm12, %v445_v56, %v447_v57 }
  0xdd   : > { %v459_v10 = vpop.permute.xlu1 %458  ;;  %750 = vrot.lane.b32.xlu1 %v1680_v40, %s1826_s26  ;;  %v513_v35 = vsel %vm2110_vm2, %v2005_v52, %v448_v42  ;;  %v1079_v52 = vsel %vm2110_vm2, %v1897_v12, %v1014_v45  ;;  %v514_v57 = vsel %vm2110_vm2, %v2017_v61, %v449_v54  ;;  %v1045_v42 = vsel %vm294_vm14, %v2100_v9, %v2106_v15 }
  0xde   : > { %v1087_v15 = vsel %vm336_vm5, %v1079_v52, %v1028_v59 }
  0xdf   : > { %v457_v26 = vpop.permute.xlu0 %456 }
  0xe0   : > { %v462_v44 = vsel %vm276_vm13, %v457_v26, %v459_v10 }
  0xe1   : > { %v474_v13 = vpop.permute.xlu1 %473  ;;  %754 = vrot.lane.b32.xlu1 %v1682_v30, %s1826_s26  ;;  %v518_v6 = vsel %vm336_vm5, %v513_v35, %v462_v44 }
  0xe3   : > { %v461_v53 = vpop.permute.xlu0 %460 }
  0xe4   : > { %v463_v40 = vsel %vm276_vm13, %v459_v10, %v461_v53  ;;  %v526_v56 = vsel %vm336_vm5, %v515_v63, %v461_v53  ;;  %v1083_v10 = vsel %vm336_vm5, %v1078_v5, %v1027_v8  ;;  %v269_v8 = vrot.slane %v2057_v41, 5 }
  0xe5   : > { %v478_v36 = vpop.permute.xlu1 %477  ;;  %v522_v53 = vsel %vm336_vm5, %v514_v57, %v463_v40 }
  0xe6   : > { %v530_v12 = vsel %vm2122_vm6, %v526_v56, %v478_v36  ;;  %v283_v56 = vrot.slane %v243_v38, 4 }
  0xe7   : > { %v476_v47 = vpop.permute.xlu0 %475 }
  0xe8   : > { %v479_v55 = vsel %vm294_vm14, %v474_v13, %v476_v47  ;;  %v480_v26 = vsel %vm294_vm14, %v476_v47, %v478_v36  ;;  %v1044_v13 = vsel %vm294_vm14, %v2088_v1, %v2100_v9  ;;  %v1075_v1 = vsel %vm326_vm9, %v2086_v0, %v2116_v21 }
  0xe9   : > { %v505_v17 = vpop.permute.xlu1 %504  ;;  %v528_v58 = vsel %vm2122_vm6, %v518_v6, %v479_v55  ;;  %v529_v61 = vsel %vm2122_vm6, %v522_v53, %v480_v26  ;;  %v1076_v36 = vsel %vm326_vm9, %v2116_v21, %v2114_v20  ;;  %v1093_v55 = vsel %vm2122_vm6, %v1083_v10, %v1044_v13 }
  0xea   : > { %v1098_v20 = vsel %vm355_vm10, %v1093_v55, %v1075_v1  ;;  %v282_v6 = vrot.slane %v240_v37, 3 }
  0xeb   : > { %v503_v32 = vpop.permute.xlu0 %502  ;;  %v1108_v40 = vsel %vm2134_vm11, %v1098_v20, 0 }
  0xec   : > { %v510_v2 = vsel %vm326_vm9, %v503_v32, %v505_v17  ;;  %v1094_v32 = vsel %vm2122_vm6, %v1087_v15, %v1045_v42 }
  0xed   : > { %v509_v30 = vpop.permute.xlu1 %508  ;;  %v533_v60 = vsel %vm355_vm10, %v528_v58, %v510_v2  ;;  %v1102_v21 = vsel %vm355_vm10, %v1094_v32, %v1076_v36 }
  0xee   : > { %v1109_v2 = vsel %vm2134_vm11, %v1102_v21, 0 }
  0xef   : > { %v507_v62 = vpop.permute.xlu0 %506  ;;  %v1687_v26 = vcombine.low %v1108_v40, %v1109_v2  ;;  %v1689_v59 = vcombine.high %v1108_v40, %v1109_v2 }
  0xf0   : > { %v511_v47 = vsel %vm326_vm9, %v505_v17, %v507_v62  ;;  %v512_v49 = vsel %vm326_vm9, %v507_v62, %v509_v30  ;;  %v543_v17 = vsel %vm2134_vm11, %v533_v60, 0  ;;  %v284_v30 = vor.u32 %v283_v56, %v282_v6 }
  0xf1   : > { %v537_v44 = vsel %vm355_vm10, %v529_v61, %v511_v47  ;;  %v541_v45 = vsel %vm355_vm10, %v530_v12, %v512_v49  ;;  %v2338_v37 = vpop.permute.xlu1 %257 }
  0xf2   : > { %v544_v5 = vsel %vm2134_vm11, %v537_v44, 0  ;;  %v545_v9 = vsel %vm2134_vm11, %v541_v45, 0 }
  0xf3   : > { %v1675_v0 = vcombine.low %v543_v17, %v544_v5  ;;  %v1676_v54 = vcombine.low %v545_v9, %v545_v9  ;;  %v1677_v63 = vcombine.high %v543_v17, %v544_v5  ;;  %v1678_v35 = vcombine.high %v545_v9, %v545_v9 }
  0xf5   : > { %559 = vrot.lane.b32.xlu1 %v1675_v0, %s1827_s27  ;;  %561 = vrot.lane.b32.xlu0 %v1676_v54, %s1827_s27  ;;  %v2346_v38 = vpop.permute.xlu1 %270 }
  0xf9   : > { %563 = vrot.lane.b32.xlu1 %v1677_v63, %s1827_s27  ;;  %565 = vrot.lane.b32.xlu0 %v1678_v35, %s1827_s27  ;;  %s1839_s27 = smov 80  }
  0xfd   : > { %274 = vrot.lane.b32.xlu1 %v269_v8, %s1819_s20  ;;  %1124 = vrot.lane.b32.xlu0 %v1687_v26, %s1824_s24 }
 0x101   : > { %1128 = vrot.lane.b32.xlu0 %v1689_v59, %s1824_s24  ;;  %290 = vrot.lane.b32.xlu1 %v284_v30, %s1822_s23 }
 0x105   : > { %936 = vrot.lane.b32.xlu0 %v1683_v29, %s1825_s25  ;;  %318 = vrot.lane.b32.xlu1 %v1918_v28, %s1821_s22  ;;  %v268_v28 = vrot.slane %v2047_v33, 5 }
 0x109   : > { %940 = vrot.lane.b32.xlu0 %v1685_v24, %s1825_s25  ;;  %322 = vrot.lane.b32.xlu1 %v1944_v50, %s1821_s22  ;;  %v2381_v24 = vpop.permute.xlu0 %255  ;;  %s1837_s25 = smov 92  }
 0x10d   : > { %748 = vrot.lane.b32.xlu0 %v1679_v46, %s1826_s26  ;;  %1175 = vperm.xlu1 %1780, %v1171_v4   ;;  %v2384_v25 = vpop.permute.xlu0 %259 }
 0x111   : > { %752 = vrot.lane.b32.xlu0 %v1681_v48, %s1826_s26  ;;  %s1838_s26 = smov 84  }
 0x115   : > { %272 = vrot.lane.b32.xlu0 %v268_v28, %s1819_s20 }
 0x119   : > { %288 = vrot.lane.b32.xlu0 %v281_v7, %s1822_s23  ;;  %v1172_v7 = vld [vmem:[%s2543_s2 + $0x8] sm:$0xff] }
 0x11b   : > { %v1127_v50 = vpop.permute.xlu1 %1126 }
 0x11c   : > { %1146 = vst.msk [vmem:[#allocation2 + $0x68] sm:$0xf] %vm392_vm15, %v1127_v50  ;;  %v1133_v47 = vrot.slane %v1127_v50, 4 }
 0x11d   : > { %292 = vrot.lane.b32.xlu0 %v287_v16, %s1822_s23 }
 0x11f   : > { %v1131_v22 = vpop.permute.xlu1 %1130 }
 0x120   : > { %1148 = vst.msk [vmem:[#allocation2 + $0x74] sm:$0xf] %vm392_vm15, %v1131_v22  ;;  %v1135_v36 = vrot.slane %v1131_v22, 4 }
 0x121   : > { %320 = vrot.lane.b32.xlu0 %v1908_v19, %s1821_s22 }
 0x125   : > { %324 = vrot.lane.b32.xlu0 %v1929_v43, %s1821_s22  ;;  %s1836_s22 = smov 112  }
 0x127   : > { %v1788_v3 = vld [vmem:[#allocation2 + $0x68] ss:$12 sps:$4 sm:$0xff]  }
 0x128   : > { %1720 = vmatpush3.bf16.msra.mxu1 %v1788_v3 }
 0x129   : > { %1721 = vmatprep.subr.bf16.mxu1 %v1823_v39  ;;  %1180 = vperm.xlu0 %1781, %v1172_v7  }
 0x133   : > { %v939_v19 = vpop.permute.xlu1 %938 }
 0x134   : > { %958 = vst.msk [vmem:[#allocation2 + $0x50] sm:$0xf] %vm392_vm15, %v939_v19  ;;  %v945_v0 = vrot.slane %v939_v19, 4 }
 0x137   : > { %v943_v43 = vpop.permute.xlu1 %942 }
 0x138   : > { %960 = vst.msk [vmem:[#allocation2 + $0x5c] sm:$0xf] %vm392_vm15, %v943_v43  ;;  %v947_v35 = vrot.slane %v943_v43, 4 }
 0x13f   : > { %v1789_v11 = vld [vmem:[#allocation2 + $0x50] ss:$12 sps:$4 sm:$0xff]  }
 0x140   : > { %1722 = vmatpush3.bf16.msra.mxu1 %v1789_v11 }
 0x141   : > { %1723 = vmatprep.subr.bf16.mxu1 %v1823_v39 }
 0x14f   : > { %v2373_v14 = vpop.permute.xlu1 %750 }
 0x150   : > { %770 = vst.msk [vmem:[#allocation2 + $0x38] sm:$0xf] %vm392_vm15, %v2373_v14  ;;  %v757_v6 = vrot.slane %v2373_v14, 4 }
 0x153   : > { %v2377_v16 = vpop.permute.xlu1 %754 }
 0x154   : > { %772 = vst.msk [vmem:[#allocation2 + $0x44] sm:$0xf] %vm392_vm15, %v2377_v16  ;;  %v759_v22 = vrot.slane %v2377_v16, 4  ;;  %v262_v16 = vsel %vm261_vm12, %v2381_v24, %v2338_v37 }
 0x155   : > { %v333_v24 = vsel %vm2110_vm2, %v2040_v27, %v262_v16 }
 0x15b   : > { %v1790_v29 = vld [vmem:[#allocation2 + $0x38] ss:$12 sps:$4 sm:$0xff]  }
 0x15c   : > { %1724 = vmatpush3.bf16.msra.mxu1 %v1790_v29 }
 0x15d   : > { %1725 = vmatprep.subr.bf16.mxu1 %v1823_v39 }
 0x167   : > { %v560_v31 = vpop.permute.xlu1 %559  ;;  %v562_v46 = vpop.permute.xlu0 %561 }
 0x168   : > { %v567_v48 = vrot.slane %v560_v31, 4  ;;  %v568_v52 = vrot.slane %v562_v46, 4  ;;  %582 = vst.msk [vmem:[#allocation2 + $0x20] sm:$0xf] %vm392_vm15, %v562_v46 }
 0x16a   : > { %v572_v57 = vsel %vm571_vm1, %v567_v48, %v568_v52  ;;  %v263_v52 = vsel %vm261_vm12, %v2338_v37, %v2384_v25  ;;  %vm1423_vm12 = vcmask 654848  }
 0x16b   : > { %v2388_v58 = vsel %vm573_vm3, %v560_v31, %v572_v57  ;;  %v564_v10 = vpop.permute.xlu1 %563  ;;  %v566_v13 = vpop.permute.xlu0 %565  ;;  %v334_v37 = vsel %vm2110_vm2, %v2047_v33, %v263_v52  ;;  %v335_v33 = vsel %vm2110_vm2, %v2057_v41, %v2384_v25  ;;  %vm1268_vm2 = vcmask 654336  }
 0x16c   : > { %v569_v53 = vrot.slane %v564_v10, 4  ;;  %v570_v60 = vrot.slane %v566_v13, 4  ;;  %584 = vst.msk [vmem:[#allocation2 + $0x2c] sm:$0xf] %vm392_vm15, %v566_v13 }
 0x16e   : > { %v575_v62 = vsel %vm571_vm1, %v569_v53, %v570_v60 }
 0x16f   : > { %v576_v12 = vsel %vm573_vm3, %v564_v10, %v575_v62  ;;  %v1125_v61 = vpop.permute.xlu0 %1124  ;;  %v275_v59 = vpop.permute.xlu1 %274 }
 0x170   : > { %v1132_v49 = vrot.slane %v1125_v61, 4  ;;  %v1696_v29 = vcombine.high %v2388_v58, %v576_v12  ;;  %v1695_v48 = vcombine.low %v2388_v58, %v576_v12 }
 0x172   : > { %v1136_v42 = vsel %vm571_vm1, %v1132_v49, %v1133_v47 }
 0x173   : > { %v1138_v1 = vsel %vm1137_vm4, %v1125_v61, %v1136_v42  ;;  %v1129_v44 = vpop.permute.xlu0 %1128  ;;  %v1791_v45 = vld [vmem:[#allocation2 + $0x20] ss:$12 sps:$4 sm:$0xff]   ;;  %v291_v4 = vpop.permute.xlu1 %290 }
 0x174   : > { %v1134_v17 = vrot.slane %v1129_v44, 4  ;;  %1726 = vmatpush3.bf16.msra.mxu1 %v1791_v45 }
 0x175   : > { %1727 = vmatprep.subr.bf16.mxu1 %v1823_v39 }
 0x176   : > { %v1139_v5 = vsel %vm571_vm1, %v1134_v17, %v1135_v36  ;;  %v347_v36 = vsel %vm336_vm5, %v335_v33, %v275_v59 }
 0x177   : > { %v1140_v9 = vsel %vm1137_vm4, %v1129_v44, %v1139_v5  ;;  %v937_v15 = vpop.permute.xlu0 %936  ;;  %v319_v46 = vpop.permute.xlu1 %318 }
 0x178   : > { %v944_v54 = vrot.slane %v937_v15, 4  ;;  %v1705_v55 = vcombine.high %v1138_v1, %v1140_v9  ;;  %v1704_v32 = vcombine.low %v1138_v1, %v1140_v9 }
 0x17a   : > { %v948_v20 = vsel %vm571_vm1, %v944_v54, %v945_v0  ;;  %1278 = vmatprep.subr.bf16.mxu0 %v1705_v55  ;;  %v1793_v0 = vld [vmem:[%s2542_s1] sm:$0xff]  }
 0x17b   : > { %v950_v21 = vsel %vm949_vm7, %v937_v15, %v948_v20  ;;  %v941_v63 = vpop.permute.xlu0 %940  ;;  %1279 = vmatpush1.bf16.msra.mxu0 %v1704_v32  ;;  %v323_v58 = vpop.permute.xlu1 %322 }
 0x17c   : > { %v946_v40 = vrot.slane %v941_v63, 4 }
 0x17e   : > { %v951_v2 = vsel %vm571_vm1, %v946_v40, %v947_v35 }
 0x17f   : > { %v952_v8 = vsel %vm949_vm7, %v941_v63, %v951_v2  ;;  %v749_v39 = vpop.permute.xlu0 %748 }
 0x180   : > { %v756_v56 = vrot.slane %v749_v39, 4  ;;  %v1702_v26 = vcombine.high %v950_v21, %v952_v8  ;;  %v1701_v30 = vcombine.low %v950_v21, %v952_v8 }
 0x182   : > { %v760_v28 = vsel %vm571_vm1, %v756_v56, %v757_v6  ;;  %1280 = vmatprep.subr.bf16.mxu0 %v1702_v26 }
 0x183   : > { %v762_v50 = vsel %vm761_vm8, %v749_v39, %v760_v28  ;;  %v753_v51 = vpop.permute.xlu0 %752  ;;  %1281 = vmatpush1.bf16.msra.mxu0 %v1701_v30 }
 0x184   : > { %v758_v3 = vrot.slane %v753_v51, 4 }
 0x186   : > { %v763_v7 = vsel %vm571_vm1, %v758_v3, %v759_v22 }
 0x187   : > { %v764_v19 = vsel %vm761_vm8, %v753_v51, %v763_v7  ;;  %v273_v43 = vpop.permute.xlu0 %272 }
 0x188   : > { %v1699_v11 = vcombine.high %v762_v50, %v764_v19  ;;  %v1698_v14 = vcombine.low %v762_v50, %v764_v19  ;;  %v277_v10 = vsel %vm276_vm13, %v2346_v38, %v273_v43  ;;  %v278_v13 = vsel %vm276_vm13, %v273_v43, %v275_v59  ;;  %v1176_v54 = vpop.permute.xlu1 %1175 }
 0x189   : > { %v339_v62 = vsel %vm336_vm5, %v333_v24, %v277_v10  ;;  %v343_v12 = vsel %vm336_vm5, %v334_v37, %v278_v13  ;;  %vm1371_vm5 = vcmask 130048   ;;  %vm1436_vm13 = vcmask 786048  }
 0x18a   : > { %1282 = vmatprep.subr.bf16.mxu0 %v1699_v11 }
 0x18b   : > { %v289_v31 = vpop.permute.xlu0 %288  ;;  %1283 = vmatpush1.bf16.msra.mxu0 %v1698_v14 }
 0x18c   : > { %1284 = vmatprep.subr.bf16.mxu0 %v1696_v29  ;;  %v295_v53 = vsel %vm294_vm14, %v289_v31, %v291_v4 }
 0x18d   : > { %v352_v61 = vsel %vm2122_vm6, %v339_v62, %v295_v53 }
 0x18f   : > { %v293_v57 = vpop.permute.xlu0 %292  ;;  %1285 = vmatpush1.bf16.msra.mxu0 %v1695_v48 }
 0x190   : > { %v296_v60 = vsel %vm294_vm14, %v291_v4, %v293_v57  ;;  %v354_v5 = vsel %vm2122_vm6, %v347_v36, %v293_v57  ;;  %vm1455_vm14 = vcmask 850944  }
 0x191   : > { %v353_v47 = vsel %vm2122_vm6, %v343_v12, %v296_v60  ;;  %vm1364_vm6 = vcmask 523264  }
 0x193   : > { %v321_v38 = vpop.permute.xlu0 %320 }
 0x194   : > { %v327_v49 = vsel %vm326_vm9, %v319_v46, %v321_v38  ;;  %v328_v42 = vsel %vm326_vm9, %v321_v38, %v323_v58 }
 0x195   : > { %v358_v27 = vsel %vm355_vm10, %v352_v61, %v327_v49  ;;  %v362_v1 = vsel %vm355_vm10, %v353_v47, %v328_v42 }
 0x196   : > { %v371_v44 = vsel %vm2134_vm11, %v358_v27, 0  ;;  %v372_v45 = vsel %vm2134_vm11, %v362_v1, 0 }
 0x197   : > { %v325_v17 = vpop.permute.xlu0 %324  ;;  %1286 = vmatprep.subr.bf16.mxu0 %v372_v45 }
 0x198   : > { %v329_v9 = vsel %vm326_vm9, %v323_v58, %v325_v17  ;;  %1287 = vmatpush1.bf16.msra.mxu0 %v371_v44  ;;  %vm1384_vm9 = vcmask 261248  }
 0x199   : > { %v366_v15 = vsel %vm355_vm10, %v354_v5, %v329_v9  ;;  %vm1397_vm10 = vcmask 392448  }
 0x19a   : > { %v373_v41 = vsel %vm2134_vm11, %v366_v15, 0  ;;  %vm1410_vm11 = vcmask 523648  }
 0x19b   : > { %v1672_v18 = vcombine.low %v373_v41, %v373_v41  ;;  %v1674_v25 = vcombine.high %v373_v41, %v373_v41  ;;  %1707 = vmatmul.mubr.msk.bf16.vlgmr.msra.gmra.mxu0 %vm1268_vm2, %v1793_v0 }
 0x19d   : > { %393 = vst.msk [vmem:[#allocation2 + $0x8] sm:$0xf] %vm392_vm15, %v1672_v18  ;;  %395 = vst.msk [vmem:[#allocation2 + $0x14] sm:$0xf] %vm392_vm15, %v1674_v25  ;;  %vm1460_vm15 = vcmask 917248  }
 0x1a4   : > { %v1792_v23 = vld [vmem:[#allocation2 + $0x8] ss:$12 sps:$4 sm:$0xff]   ;;  %v1181_v20 = vpop.permute.xlu0 %1180 }
 0x1a5   : > { %1728 = vmatpush3.bf16.msra.mxu1 %v1792_v23 }
 0x1a8   : > { %1730 = vmatmul.mubr.msk.bf16.vlgmr.msra.gmra.mxu1 %vm1268_vm2, %v1793_v0 }
 0x25b   : > { %v1306_v34 = vpop.f32.mrf.mxu0 }
 0x25c   : > { %v1307_v55 = vadd.f32 %v1306_v34, %v1176_v54 }
 0x25d   : > { %v1308_v32 = vpop.f32.mrf.mxu0 }
 0x25e   : > { %v1356_v21 = vmax.f32 %v1307_v55, 0.0  ;;  %v1309_v63 = vadd.f32 %v1308_v32, %v1176_v54 }
 0x25f   : > { %v1310_v35 = vpop.f32.mrf.mxu0 }
 0x260   : > { %v1357_v40 = vmax.f32 %v1309_v63, 0.0  ;;  %v1311_v2 = vadd.f32 %v1310_v35, %v1181_v20  ;;  %1372 = vst.msk [vmem:[%s2456_s10] sm:$0xff] %vm1371_vm5, %v1356_v21 }
 0x261   : > { %v1312_v8 = vpop.f32.mrf.mxu0 }
 0x262   : > { %v1313_v39 = vadd.f32 %v1312_v8, %v1181_v20  ;;  %v1359_v6 = vmax.f32 %v1311_v2, 0.0 }
 0x264   : > { %v1360_v56 = vmax.f32 %v1313_v39, 0.0  ;;  %1373 = vst.msk [vmem:[%s2456_s10 + $0x10] sm:$0xff] %vm1371_vm5, %v1359_v6 }
 0x268   : > { %v1349_v26 = vpop.f32.mrf.mxu1 }
 0x269   : > { %v1350_v30 = vadd.f32 %v1349_v26, %v1176_v54 }
 0x26a   : > { %v1731_v59 = vpop.f32.mrf.mxu1 }
 0x26b   : > { %v1358_v28 = vmax.f32 %v1350_v30, 0.0 }
 0x26c   : > { %v1352_v50 = vpop.f32.mrf.mxu1 }
 0x26d   : > { %1365 = vst.msk [vmem:[#allocation3 + $0x10] sm:$0xff] %vm1364_vm6, %v1358_v28  ;;  %v1353_v51 = vadd.f32 %v1352_v50, %v1181_v20 }
 0x26e   : > { %v1732_v22 = vpop.f32.mrf.mxu1 }
 0x26f   : > { %v1361_v3 = vmax.f32 %v1353_v51, 0.0 }
 0x271   : > { %1368 = vst.msk [vmem:[#allocation3 + $0x28] sm:$0xff] %vm1364_vm6, %v1361_v3 }
 0x274   : > { %v1536_v4 = vld [vmem:[#allocation3 + $0x10] sm:$0xff] }
 0x275   : > { %1540 = vrot.lane.b32.xlu0 %v1536_v4, %s1830_s11 }
 0x278   : > { %v1537_v7 = vld [vmem:[#allocation3 + $0x28] sm:$0xff] }
 0x279   : > { %1552 = vrot.lane.b32.xlu0 %v1536_v4, %s1831_s12  ;;  %1542 = vrot.lane.b32.xlu1 %v1537_v7, %s1830_s11 }
 0x27d   : > { %1378 = vrot.lane.b32.xlu0 %v1356_v21, %s1824_s24  ;;  %1554 = vrot.lane.b32.xlu1 %v1537_v7, %s1831_s12 }
 0x281   : > { %1391 = vrot.lane.b32.xlu0 %v1356_v21, %s1832_s16  ;;  %1480 = vrot.lane.b32.xlu1 %v1357_v40, %s1833_s17 }
 0x285   : > { %1404 = vrot.lane.b32.xlu0 %v1356_v21, %s1834_s18  ;;  %1449 = vrot.lane.b32.xlu1 %v1357_v40, %s1835_s19 }
 0x289   : > { %1417 = vrot.lane.b32.xlu0 %v1356_v21, %s1836_s22  ;;  %1380 = vrot.lane.b32.xlu1 %v1359_v6, %s1824_s24 }
 0x28d   : > { %1430 = vrot.lane.b32.xlu0 %v1356_v21, %s1820_s21  ;;  %1393 = vrot.lane.b32.xlu1 %v1359_v6, %s1832_s16 }
 0x291   : > { %1447 = vrot.lane.b32.xlu0 %v1356_v21, %s1835_s19  ;;  %1406 = vrot.lane.b32.xlu1 %v1359_v6, %s1834_s18 }
 0x295   : > { %1492 = vrot.lane.b32.xlu0 %v1357_v40, %s1837_s25  ;;  %1419 = vrot.lane.b32.xlu1 %v1359_v6, %s1836_s22 }
 0x299   : > { %1504 = vrot.lane.b32.xlu0 %v1357_v40, %s1819_s20  ;;  %1432 = vrot.lane.b32.xlu1 %v1359_v6, %s1820_s21 }
 0x29d   : > { %1516 = vrot.lane.b32.xlu0 %v1357_v40, %s1838_s26  ;;  %1482 = vrot.lane.b32.xlu1 %v1360_v56, %s1833_s17 }
 0x2a1   : > { %1528 = vrot.lane.b32.xlu0 %v1357_v40, %s1839_s27  ;;  %1494 = vrot.lane.b32.xlu1 %v1360_v56, %s1837_s25 }
 0x2a5   : > { %1467 = vrot.lane.b32.xlu0 %v1357_v40, %s1840_s28  ;;  %1506 = vrot.lane.b32.xlu1 %v1360_v56, %s1819_s20 }
 0x2a9   : > { %1451 = vrot.lane.b32.xlu0 %v1359_v6, %s1835_s19  ;;  %1518 = vrot.lane.b32.xlu1 %v1360_v56, %s1838_s26 }
 0x2ad   : > { %1564 = vrot.lane.b32.xlu0 %v1536_v4, %s1822_s23  ;;  %1530 = vrot.lane.b32.xlu1 %v1360_v56, %s1839_s27 }
 0x2b1   : > { %1453 = vrot.lane.b32.xlu1 %v1360_v56, %s1835_s19 }
 0x2b5   : > { %1469 = vrot.lane.b32.xlu1 %v1360_v56, %s1840_s28 }
 0x2b9   : > { %1566 = vrot.lane.b32.xlu1 %v1537_v7, %s1822_s23 }
 0x2e7   : > { %v1541_v19 = vpop.permute.xlu0 %1540 }
 0x2eb   : > { %v1543_v43 = vpop.permute.xlu1 %1542  ;;  %v1553_v11 = vpop.permute.xlu0 %1552 }
 0x2ef   : > { %v1555_v14 = vpop.permute.xlu1 %1554  ;;  %v1379_v29 = vpop.permute.xlu0 %1378 }
 0x2f0   : > { %1385 = vst.msk [vmem:[%s2456_s10] sm:$0xff] %vm1384_vm9, %v1379_v29 }
 0x2f3   : > { %v1481_v31 = vpop.permute.xlu1 %1480  ;;  %v1392_v46 = vpop.permute.xlu0 %1391 }
 0x2f4   : > { %1486 = vst.msk [vmem:[%s2456_s10 + $0x8] sm:$0xff] %vm1371_vm5, %v1481_v31 }
 0x2f5   : > { %1398 = vst.msk [vmem:[%s2456_s10] sm:$0xff] %vm1397_vm10, %v1392_v46 }
 0x2f7   : > { %v1450_v48 = vpop.permute.xlu1 %1449  ;;  %v1405_v16 = vpop.permute.xlu0 %1404 }
 0x2f8   : > { %1411 = vst.msk [vmem:[%s2456_s10] sm:$0xff] %vm1410_vm11, %v1405_v16 }
 0x2fb   : > { %v1381_v52 = vpop.permute.xlu1 %1380  ;;  %v1418_v57 = vpop.permute.xlu0 %1417 }
 0x2fc   : > { %1386 = vst.msk [vmem:[%s2456_s10 + $0x10] sm:$0xff] %vm1384_vm9, %v1381_v52 }
 0x2fd   : > { %1424 = vst.msk [vmem:[%s2456_s10] sm:$0xff] %vm1423_vm12, %v1418_v57 }
 0x2ff   : > { %v1394_v10 = vpop.permute.xlu1 %1393  ;;  %v1431_v13 = vpop.permute.xlu0 %1430 }
 0x300   : > { %1399 = vst.msk [vmem:[%s2456_s10 + $0x10] sm:$0xff] %vm1397_vm10, %v1394_v10 }
 0x301   : > { %1437 = vst.msk [vmem:[%s2456_s10] sm:$0xff] %vm1436_vm13, %v1431_v13 }
 0x303   : > { %v1407_v53 = vpop.permute.xlu1 %1406  ;;  %v1448_v60 = vpop.permute.xlu0 %1447 }
 0x304   : > { %1412 = vst.msk [vmem:[%s2456_s10 + $0x10] sm:$0xff] %vm1410_vm11, %v1407_v53  ;;  %v1456_v58 = vsel %vm1455_vm14, %v1448_v60, %v1450_v48 }
 0x305   : > { %1461 = vst.msk [vmem:[%s2456_s10] sm:$0xff] %vm1460_vm15, %v1456_v58 }
 0x307   : > { %v1420_v24 = vpop.permute.xlu1 %1419  ;;  %v1493_v37 = vpop.permute.xlu0 %1492 }
 0x308   : > { %1425 = vst.msk [vmem:[%s2456_s10 + $0x10] sm:$0xff] %vm1423_vm12, %v1420_v24 }
 0x309   : > { %1498 = vst.msk [vmem:[%s2456_s10 + $0x8] sm:$0xff] %vm1384_vm9, %v1493_v37 }
 0x30b   : > { %v1433_v62 = vpop.permute.xlu1 %1432  ;;  %v1505_v12 = vpop.permute.xlu0 %1504 }
 0x30c   : > { %1438 = vst.msk [vmem:[%s2456_s10 + $0x10] sm:$0xff] %vm1436_vm13, %v1433_v62 }
 0x30d   : > { %1510 = vst.msk [vmem:[%s2456_s10 + $0x8] sm:$0xff] %vm1397_vm10, %v1505_v12 }
 0x30f   : > { %v1483_v38 = vpop.permute.xlu1 %1482  ;;  %v1517_v61 = vpop.permute.xlu0 %1516 }
 0x310   : > { %1487 = vst.msk [vmem:[%s2456_s10 + $0x18] sm:$0xff] %vm1371_vm5, %v1483_v38 }
 0x311   : > { %1522 = vst.msk [vmem:[%s2456_s10 + $0x8] sm:$0xff] %vm1410_vm11, %v1517_v61 }
 0x313   : > { %v1495_v47 = vpop.permute.xlu1 %1494  ;;  %v1529_v49 = vpop.permute.xlu0 %1528 }
 0x314   : > { %1499 = vst.msk [vmem:[%s2456_s10 + $0x18] sm:$0xff] %vm1384_vm9, %v1495_v47 }
 0x315   : > { %1534 = vst.msk [vmem:[%s2456_s10 + $0x8] sm:$0xff] %vm1423_vm12, %v1529_v49 }
 0x316   : > { %1546 = vst.msk [vmem:[%s2456_s10 + $0x8] sm:$0xff] %vm1436_vm13, %v1541_v19 }
 0x317   : > { %1558 = vst.msk [vmem:[%s2456_s10 + $0x8] sm:$0xff] %vm1460_vm15, %v1553_v11  ;;  %v1507_v42 = vpop.permute.xlu1 %1506  ;;  %v1468_v27 = vpop.permute.xlu0 %1467 }
 0x318   : > { %1511 = vst.msk [vmem:[%s2456_s10 + $0x18] sm:$0xff] %vm1397_vm10, %v1507_v42 }
 0x319   : > { %1474 = vst.msk [vmem:[%s2456_s10] sm:$0xff] %vm1473_vm0, %v1468_v27 }
 0x31b   : > { %v1519_v1 = vpop.permute.xlu1 %1518  ;;  %v1452_v33 = vpop.permute.xlu0 %1451 }
 0x31c   : > { %1523 = vst.msk [vmem:[%s2456_s10 + $0x18] sm:$0xff] %vm1410_vm11, %v1519_v1 }
 0x31f   : > { %v1531_v44 = vpop.permute.xlu1 %1530  ;;  %v1565_v45 = vpop.permute.xlu0 %1564 }
 0x320   : > { %1535 = vst.msk [vmem:[%s2456_s10 + $0x18] sm:$0xff] %vm1423_vm12, %v1531_v44 }
 0x321   : > { %1570 = vst.msk [vmem:[%s2456_s10 + $0x8] sm:$0xff] %vm1473_vm0, %v1565_v45 }
 0x322   : > { %1547 = vst.msk [vmem:[%s2456_s10 + $0x18] sm:$0xff] %vm1436_vm13, %v1543_v43 }
 0x323   : > { %1559 = vst.msk [vmem:[%s2456_s10 + $0x18] sm:$0xff] %vm1460_vm15, %v1555_v14  ;;  %v1454_v36 = vpop.permute.xlu1 %1453 }
 0x324   : > { %v1457_v17 = vsel %vm1455_vm14, %v1452_v33, %v1454_v36 }
 0x325   : > { %1462 = vst.msk [vmem:[%s2456_s10 + $0x10] sm:$0xff] %vm1460_vm15, %v1457_v17 }
 0x327   : > { %v1470_v5 = vpop.permute.xlu1 %1469 }
 0x328   : > { %1475 = vst.msk [vmem:[%s2456_s10 + $0x10] sm:$0xff] %vm1473_vm0, %v1470_v5 }
 0x32b   : > { %v1567_v9 = vpop.permute.xlu1 %1566 }
 0x32c   : > { %1571 = vst.msk [vmem:[%s2456_s10 + $0x18] sm:$0xff] %vm1473_vm0, %v1567_v9 }
 0x32d PF: > { %s13_s14 = sadd.s32 1, %s1816_s14   ;;  %s2551_s12 = smov %s1812_s13 }
 0x32e   : > { %p10_p5 = scmp.ge.s32.totalorder %s13_s14, 4   ;;  %s2552_s13 = smov %s2554_s15 }
 0x330   :  { %12 = sbr.rel (!%p10_p5) target bundleno = 2 (0x2), region = 62 }

</bundles_post_ra>
